<compile_context>
chip_gen: v7x
topology: tpu7x:2x2x1
jax: 0.10.0
libtpu: 0.0.40
codegen_flags: <defaults>
</compile_context>

<pallas_src>
import math

import numpy as np
import jax
import jax.numpy as jnp
from jax import lax
from jax.experimental import pallas as pl
from jax.experimental.pallas import tpu as pltpu

MXU_DTYPE = jnp.bfloat16     # matmul-operand dtype (accumulation is always f32)
KSIZE = 4                    # every conv in _netG uses a 4x4 kernel


# ----------------------------------------------------------------------------
# Init-time weight factoring (runs once, outside the forward pass).
# ----------------------------------------------------------------------------
def _factor_conv(w, stride, pad, in_hw, batch):
    """torch Conv2d weight (OC, IC, KH, KW) -> (S_all, M_all, (OH, OW))."""
    w = np.asarray(w, np.float32)
    oc_n, ic_n, kh_n, kw_n = w.shape
    ih, iw = in_hw
    oh = (ih + 2 * pad - kh_n) // stride + 1
    ow = (iw + 2 * pad - kw_n) // stride + 1
    S = np.zeros((kh_n, batch * oh, batch * ih), np.float32)
    M = np.zeros((kh_n, ic_n * iw, oc_n * ow), np.float32)
    ic_idx = np.arange(ic_n)[:, None] * iw
    oc_idx = np.arange(oc_n)[None, :] * ow
    for kh in range(kh_n):
        for oy in range(oh):
            iy = stride * oy - pad + kh
            if 0 <= iy < ih:
                for b in range(batch):
                    S[kh, b * oh + oy, b * ih + iy] = 1.0
        for ox in range(ow):
            for kw in range(kw_n):
                ix = stride * ox - pad + kw
                if 0 <= ix < iw:
                    M[kh, ic_idx + ix, oc_idx + ox] = w[:, :, kh, kw].T
    return (S.reshape(kh_n * batch * oh, batch * ih),
            M.reshape(kh_n * ic_n * iw, oc_n * ow), (oh, ow))


def _factor_convT(w, stride, pad, in_hw, batch):
    """torch ConvTranspose2d weight (IC, OC, KH, KW) -> (S_all, M_all, (OH, OW))."""
    w = np.asarray(w, np.float32)
    ic_n, oc_n, kh_n, kw_n = w.shape
    ih, iw = in_hw
    oh = stride * (ih - 1) + kh_n - 2 * pad
    ow = stride * (iw - 1) + kw_n - 2 * pad
    S = np.zeros((kh_n, batch * oh, batch * ih), np.float32)
    M = np.zeros((kh_n, ic_n * iw, oc_n * ow), np.float32)
    ic_idx = np.arange(ic_n)[:, None] * iw
    oc_idx = np.arange(oc_n)[None, :] * ow
    for kh in range(kh_n):
        for iy in range(ih):
            oy = stride * iy + kh - pad
            if 0 <= oy < oh:
                for b in range(batch):
                    S[kh, b * oh + oy, b * ih + iy] = 1.0
        for ix in range(iw):
            for kw in range(kw_n):
                ox = stride * ix + kw - pad
                if 0 <= ox < ow:
                    M[kh, ic_idx + ix, oc_idx + ox] = w[:, :, kh, kw]
    return (S.reshape(kh_n * batch * oh, batch * ih),
            M.reshape(kh_n * ic_n * iw, oc_n * ow), (oh, ow))


def _bn_pool_mats(c, hw, batch):
    # P : (C*W, C)   column c' averages the x positions of channel c' (the
    #                1/(B*H*W) factor makes the in-kernel row-sum a full mean).
    # PT: (C, C*W)   row c' broadcasts a per-channel scalar over channel c'.
    lane_c = np.arange(c * hw) // hw
    ind = (lane_c[:, None] == np.arange(c)[None, :]).astype(np.float32)
    return ind / float(batch * hw * hw), ind.T


def init_raw_params(key, image_size, nc, ngf, nz):
    n = int(math.log2(image_size))
    assert 2 ** n == image_size and n >= 3
    keys = iter(jax.random.split(key, 64))
    s = 0.05
    p = {"e_conv0_w": jax.random.normal(next(keys), (ngf, nc, 4, 4)) * s}
    enc = []
    for i in range(n - 3):
        cout = ngf * 2 ** (i + 1)
        enc.append(dict(
            w=jax.random.normal(next(keys), (cout, ngf * 2 ** i, 4, 4)) * s,
            gamma=jnp.ones((cout,), jnp.float32),
            beta=jnp.zeros((cout,), jnp.float32)))
    p["e_pyr"] = enc
    cf = ngf * 2 ** (n - 3)
    p["conv1_w"] = jax.random.normal(next(keys), (nz, cf, 4, 4)) * s   # bias=True
    p["conv1_b"] = jax.random.normal(next(keys), (nz,)) * s
    p["conv2_w"] = jax.random.normal(next(keys), (nz, cf, 4, 4)) * s   # bias=True
    p["conv2_b"] = jax.random.normal(next(keys), (nz,)) * s
    p["d_conv0_w"] = jax.random.normal(next(keys), (nz, cf, 4, 4)) * s  # bias=False
    p["d_bn0_gamma"] = jnp.ones((cf,), jnp.float32)
    p["d_bn0_beta"] = jnp.zeros((cf,), jnp.float32)
    dec = []
    for i in range(n - 3, 0, -1):
        cin, cout = ngf * 2 ** i, ngf * 2 ** (i - 1)
        dec.append(dict(
            w=jax.random.normal(next(keys), (cin, cout, 4, 4)) * s,    # bias=False
            gamma=jnp.ones((cout,), jnp.float32),
            beta=jnp.zeros((cout,), jnp.float32)))
    p["d_pyr"] = dec
    p["d_out_w"] = jax.random.normal(next(keys), (ngf, nc, 4, 4)) * s  # bias=False
    return p


def pack_params(raw, image_size, nc, ngf, nz, batch, mxu_dtype=MXU_DTYPE):
    """Build the flat operand list consumed by the fused kernel (order matters)."""
    n = int(math.log2(image_size))
    ops = []

    def add_bn(gamma, beta, c, hw):
        P, PT = _bn_pool_mats(c, hw, batch)
        ops.append(jnp.asarray(P, mxu_dtype))     # entries are exact powers of 2
        ops.append(jnp.asarray(PT, mxu_dtype))    # entries are 0/1
        ops.append(jnp.stack([gamma, beta]).astype(jnp.float32))      # (2, C)

    # ---- encoder ----
    s = image_size
    S, M, (s, _) = _factor_conv(raw["e_conv0_w"], 2, 1, (s, s), batch)
    ops += [jnp.asarray(S, mxu_dtype), jnp.asarray(M, mxu_dtype)]
    for layer in raw["e_pyr"]:
        cout = layer["w"].shape[0]
        S, M, (s, _) = _factor_conv(layer["w"], 2, 1, (s, s), batch)
        ops += [jnp.asarray(S, mxu_dtype), jnp.asarray(M, mxu_dtype)]
        add_bn(layer["gamma"], layer["beta"], cout, s)

    # ---- fused mu / logvar heads (4x4 valid conv -> 1x1, bias=True) ----
    S1, M1, _ = _factor_conv(raw["conv1_w"], 1, 0, (s, s), batch)
    S2, M2, _ = _factor_conv(raw["conv2_w"], 1, 0, (s, s), batch)
    assert np.array_equal(S1, S2)
    ops += [jnp.asarray(S1, mxu_dtype),
            jnp.asarray(np.concatenate([M1, M2], axis=1), mxu_dtype),
            jnp.concatenate([raw["conv1_b"],
                             raw["conv2_b"]])[None, :].astype(jnp.float32)]

    # ---- decoder ----
    cf = ngf * 2 ** (n - 3)
    S, M, (s, _) = _factor_convT(raw["d_conv0_w"], 1, 0, (1, 1), batch)
    ops += [jnp.asarray(S, mxu_dtype), jnp.asarray(M, mxu_dtype)]
    add_bn(raw["d_bn0_gamma"], raw["d_bn0_beta"], cf, s)
    for layer in raw["d_pyr"]:
        cout = layer["w"].shape[1]
        S, M, (s, _) = _factor_convT(layer["w"], 2, 1, (s, s), batch)
        ops += [jnp.asarray(S, mxu_dtype), jnp.asarray(M, mxu_dtype)]
        add_bn(layer["gamma"], layer["beta"], cout, s)
    S, M, (s, _) = _factor_convT(raw["d_out_w"], 2, 1, (s, s), batch)
    ops += [jnp.asarray(S, mxu_dtype), jnp.asarray(M, mxu_dtype)]

    meta = dict(n_enc_pyr=n - 3, n_dec_pyr=n - 3, nz=nz)
    return ops, meta


# ----------------------------------------------------------------------------
# The single fused Pallas kernel.
# ----------------------------------------------------------------------------
def _make_fused_kernel(n_enc_pyr, n_dec_pyr, nz):

    def lrelu(y):
        return jnp.maximum(y, 0.2 * y)            # LeakyReLU(0.2): one VPU op

    def conv(h, s_ref, m_ref):
        # out_slab = sum_kh (S_kh @ h) @ M_kh ; bf16 MXU operands, f32 accum.
        r_out = s_ref.shape[0] // KSIZE
        icw = h.shape[1]
        r_all = jnp.dot(s_ref[...], h.astype(s_ref.dtype),
                        preferred_element_type=jnp.float32)
        out = None
        for k in range(KSIZE):
            rk = r_all[k * r_out:(k + 1) * r_out, :].astype(m_ref.dtype)
            contrib = jnp.dot(rk, m_ref[k * icw:(k + 1) * icw, :],
                              preferred_element_type=jnp.float32)
            out = contrib if out is None else out + contrib
        return out

    def batchnorm(y, p_ref, pt_ref, gb_ref):
        # Training-mode BatchNorm2d (biased batch variance, eps=1e-5) on a
        # (B*OH, C*OW) slab.  Per-channel reduce / broadcast-back are tiny
        # matmuls against the pooling matrices; gamma/beta are folded into a
        # single per-channel scale/shift (one mul + one add per element).
        rows = y.shape[0]
        st = jnp.dot(jnp.concatenate([y, y * y], axis=0), p_ref[...],
                     preferred_element_type=jnp.float32)          # (2R, C)
        mean_c = jnp.sum(st[:rows], axis=0, keepdims=True)        # (1, C)
        m2_c = jnp.sum(st[rows:], axis=0, keepdims=True)          # (1, C)
        var_c = jnp.maximum(m2_c - mean_c * mean_c, 0.0)
        scale_c = lax.rsqrt(var_c + 1e-5) * gb_ref[0:1, :]        # inv * gamma
        shift_c = gb_ref[1:2, :] - mean_c * scale_c               # beta - mean*scale
        ss = jnp.dot(jnp.concatenate([scale_c, shift_c], axis=0), pt_ref[...],
                     preferred_element_type=jnp.float32)          # (2, C*OW)
        return y * ss[0:1] + ss[1:2]

    def kernel(*refs):
        out_ref = refs[-1]
        it = iter(refs[:-1])
        x = next(it)[...]
        eps = next(it)[...]

        # ---- encoder ----
        h = lrelu(conv(x, next(it), next(it)))            # input-conv + LReLU
        for _ in range(n_enc_pyr):                        # pyramid conv+BN+LReLU
            s, m, p, pt, gb = (next(it) for _ in range(5))
            h = lrelu(batchnorm(conv(h, s, m), p, pt, gb))

        # ---- fused mu / logvar heads + reparameterization sampler ----
        s, m, bias = next(it), next(it), next(it)
        ml = conv(h, s, m) + bias[...]
        mu, logvar = ml[:, :nz], ml[:, nz:]
        z = eps * jnp.exp(0.5 * logvar) + mu

        # ---- decoder ----
        s, m, p, pt, gb = (next(it) for _ in range(5))
        h = lrelu(batchnorm(conv(z, s, m), p, pt, gb))    # input-convT+BN+LReLU
        for _ in range(n_dec_pyr):                        # pyramid convT+BN+LReLU
            s, m, p, pt, gb = (next(it) for _ in range(5))
            h = lrelu(batchnorm(conv(h, s, m), p, pt, gb))
        out_ref[...] = jnp.tanh(conv(h, next(it), next(it))).astype(out_ref.dtype)

    return kernel


def make_forward(meta):
    kernel = _make_fused_kernel(meta["n_enc_pyr"], meta["n_dec_pyr"], meta["nz"])

    @jax.jit
    def forward(ops, x, eps):
        B, C, H, W = x.shape
        # NCHW -> 2-D slab: rows = b*H + y, lanes = c*W + x.
        x_slab = jnp.transpose(x, (0, 2, 1, 3)).reshape(B * H, C * W)
        operands = [x_slab, eps] + list(ops)
        out_slab = pl.pallas_call(
            kernel,
            out_shape=jax.ShapeDtypeStruct((B * H, C * W), jnp.float32),
            grid=(1,),
            in_specs=[pl.BlockSpec(op.shape, lambda i: (0, 0)) for op in operands],
            out_specs=pl.BlockSpec((B * H, C * W), lambda i: (0, 0)),
            compiler_params=pltpu.CompilerParams(
                dimension_semantics=("arbitrary",),
                vmem_limit_bytes=32 * 1024 * 1024),
        )(*operands)
        # slab -> NCHW (output channels/spatial match the input for _netG).
        return jnp.transpose(out_slab.reshape(B, H, C, W), (0, 2, 1, 3))

    return forward


# ----------------------------------------------------------------------------
# Pure-JAX (f32, XLA) reference of the torch module, for a parity check.
# ----------------------------------------------------------------------------
def reference_forward(raw, x, eps):
    dn = ("NCHW", "OIHW", "NCHW")

    def conv(h, w, s, p):
        return lax.conv_general_dilated(h, w, (s, s), ((p, p), (p, p)),
                                        dimension_numbers=dn)

    def convT(h, w, s, p):
        w_eq = jnp.flip(w, (2, 3)).transpose(1, 0, 2, 3)
        q = 3 - p                                 # kernel 4 -> k-1-p
        return lax.conv_general_dilated(h, w_eq, (1, 1), ((q, q), (q, q)),
                                        lhs_dilation=(s, s),
                                        dimension_numbers=dn)

    def bn(h, gamma, beta):
        mean = h.mean((0, 2, 3), keepdims=True)
        var = ((h - mean) ** 2).mean((0, 2, 3), keepdims=True)
        return ((h - mean) * lax.rsqrt(var + 1e-5)
                * gamma.reshape(1, -1, 1, 1) + beta.reshape(1, -1, 1, 1))

    def lrelu(h):
        return jnp.maximum(h, 0.2 * h)

    h = lrelu(conv(x, raw["e_conv0_w"], 2, 1))
    for layer in raw["e_pyr"]:
        h = lrelu(bn(conv(h, layer["w"], 2, 1), layer["gamma"], layer["beta"]))
    mu = conv(h, raw["conv1_w"], 1, 0) + raw["conv1_b"].reshape(1, -1, 1, 1)
    logvar = conv(h, raw["conv2_w"], 1, 0) + raw["conv2_b"].reshape(1, -1, 1, 1)
    z = eps.reshape(mu.shape) * jnp.exp(0.5 * logvar) + mu
    h = lrelu(bn(convT(z, raw["d_conv0_w"], 1, 0),
                 raw["d_bn0_gamma"], raw["d_bn0_beta"]))
    for layer in raw["d_pyr"]:
        h = lrelu(bn(convT(h, layer["w"], 2, 1), layer["gamma"], layer["beta"]))
    return jnp.tanh(convT(h, raw["d_out_w"], 2, 1))


if __name__ == "__main__":
    IMAGE_SIZE = 16   # n = 4
    NC, NGF, NZ = 3, 8, 16
    B = 2

    key = jax.random.PRNGKey(0)
    k_param, k_x, k_eps = jax.random.split(key, 3)

    raw = init_raw_params(k_param, IMAGE_SIZE, NC, NGF, NZ)
    ops, meta = pack_params(raw, IMAGE_SIZE, NC, NGF, NZ, batch=B)
    forward = make_forward(meta)

    x = jax.random.normal(k_x, (B, NC, IMAGE_SIZE, IMAGE_SIZE), dtype=jnp.float32)
    # Deterministic N(0,1) draw standing in for torch's in-sampler RNG.
    eps = jax.random.normal(k_eps, (B, NZ), dtype=jnp.float32)

    out = jax.block_until_ready(forward(ops, x, eps))
    assert out.shape == (B, NC, IMAGE_SIZE, IMAGE_SIZE), out.shape
    assert bool(jnp.all(jnp.isfinite(out)))

    # Parity check against the f32 XLA reference (kernel uses bf16 matmuls).
    ref = reference_forward(raw, x, eps)
    max_diff = float(jnp.max(jnp.abs(out - ref)))
    assert max_diff < 0.1, f"kernel/reference mismatch: max|diff|={max_diff}"

    print("KERNEL_OK")
</pallas_src>

<mosaic_0001>
module attributes {stable_mosaic.version = 11 : i64} {
  func.func @kernel(%arg0: i32, %arg1: memref<32x48xf32, #tpu.memory_space<vmem>>, %arg2: memref<2x16xf32, #tpu.memory_space<vmem>>, %arg3: memref<64x32xbf16, #tpu.memory_space<vmem>>, %arg4: memref<192x64xbf16, #tpu.memory_space<vmem>>, %arg5: memref<32x16xbf16, #tpu.memory_space<vmem>>, %arg6: memref<256x64xbf16, #tpu.memory_space<vmem>>, %arg7: memref<64x16xbf16, #tpu.memory_space<vmem>>, %arg8: memref<16x64xbf16, #tpu.memory_space<vmem>>, %arg9: memref<2x16xf32, #tpu.memory_space<vmem>>, %arg10: memref<8x8xbf16, #tpu.memory_space<vmem>>, %arg11: memref<256x32xbf16, #tpu.memory_space<vmem>>, %arg12: memref<1x32xf32, #tpu.memory_space<vmem>>, %arg13: memref<32x2xbf16, #tpu.memory_space<vmem>>, %arg14: memref<64x64xbf16, #tpu.memory_space<vmem>>, %arg15: memref<64x16xbf16, #tpu.memory_space<vmem>>, %arg16: memref<16x64xbf16, #tpu.memory_space<vmem>>, %arg17: memref<2x16xf32, #tpu.memory_space<vmem>>, %arg18: memref<64x8xbf16, #tpu.memory_space<vmem>>, %arg19: memref<256x64xbf16, #tpu.memory_space<vmem>>, %arg20: memref<64x8xbf16, #tpu.memory_space<vmem>>, %arg21: memref<8x64xbf16, #tpu.memory_space<vmem>>, %arg22: memref<2x8xf32, #tpu.memory_space<vmem>>, %arg23: memref<128x16xbf16, #tpu.memory_space<vmem>>, %arg24: memref<256x48xbf16, #tpu.memory_space<vmem>>, %arg25: memref<32x48xf32, #tpu.memory_space<vmem>>) attributes {dimension_semantics = [#tpu.dimension_semantics<arbitrary>], iteration_bounds = array<i64: 1>, scalar_prefetch = 0 : i64, scratch_operands = 0 : i64, tpu.core_type = #tpu.core_type<tc>, window_params = [{pipeline_mode = #tpu.pipeline_mode<synchronous>, transform_indices = @transform_0, window_bounds = array<i64: 32, 48>}, {pipeline_mode = #tpu.pipeline_mode<synchronous>, transform_indices = @transform_1, window_bounds = array<i64: 2, 16>}, {pipeline_mode = #tpu.pipeline_mode<synchronous>, transform_indices = @transform_2, window_bounds = array<i64: 64, 32>}, {pipeline_mode = #tpu.pipeline_mode<synchronous>, transform_indices = @transform_3, window_bounds = array<i64: 192, 64>}, {pipeline_mode = #tpu.pipeline_mode<synchronous>, transform_indices = @transform_4, window_bounds = array<i64: 32, 16>}, {pipeline_mode = #tpu.pipeline_mode<synchronous>, transform_indices = @transform_5, window_bounds = array<i64: 256, 64>}, {pipeline_mode = #tpu.pipeline_mode<synchronous>, transform_indices = @transform_6, window_bounds = array<i64: 64, 16>}, {pipeline_mode = #tpu.pipeline_mode<synchronous>, transform_indices = @transform_7, window_bounds = array<i64: 16, 64>}, {pipeline_mode = #tpu.pipeline_mode<synchronous>, transform_indices = @transform_8, window_bounds = array<i64: 2, 16>}, {pipeline_mode = #tpu.pipeline_mode<synchronous>, transform_indices = @transform_9, window_bounds = array<i64: 8, 8>}, {pipeline_mode = #tpu.pipeline_mode<synchronous>, transform_indices = @transform_10, window_bounds = array<i64: 256, 32>}, {pipeline_mode = #tpu.pipeline_mode<synchronous>, transform_indices = @transform_11, window_bounds = array<i64: 1, 32>}, {pipeline_mode = #tpu.pipeline_mode<synchronous>, transform_indices = @transform_12, window_bounds = array<i64: 32, 2>}, {pipeline_mode = #tpu.pipeline_mode<synchronous>, transform_indices = @transform_13, window_bounds = array<i64: 64, 64>}, {pipeline_mode = #tpu.pipeline_mode<synchronous>, transform_indices = @transform_14, window_bounds = array<i64: 64, 16>}, {pipeline_mode = #tpu.pipeline_mode<synchronous>, transform_indices = @transform_15, window_bounds = array<i64: 16, 64>}, {pipeline_mode = #tpu.pipeline_mode<synchronous>, transform_indices = @transform_16, window_bounds = array<i64: 2, 16>}, {pipeline_mode = #tpu.pipeline_mode<synchronous>, transform_indices = @transform_17, window_bounds = array<i64: 64, 8>}, {pipeline_mode = #tpu.pipeline_mode<synchronous>, transform_indices = @transform_18, window_bounds = array<i64: 256, 64>}, {pipeline_mode = #tpu.pipeline_mode<synchronous>, transform_indices = @transform_19, window_bounds = array<i64: 64, 8>}, {pipeline_mode = #tpu.pipeline_mode<synchronous>, transform_indices = @transform_20, window_bounds = array<i64: 8, 64>}, {pipeline_mode = #tpu.pipeline_mode<synchronous>, transform_indices = @transform_21, window_bounds = array<i64: 2, 8>}, {pipeline_mode = #tpu.pipeline_mode<synchronous>, transform_indices = @transform_22, window_bounds = array<i64: 128, 16>}, {pipeline_mode = #tpu.pipeline_mode<synchronous>, transform_indices = @transform_23, window_bounds = array<i64: 256, 48>}, {pipeline_mode = #tpu.pipeline_mode<synchronous>, transform_indices = @transform_24, window_bounds = array<i64: 32, 48>}]} {
    %c0 = arith.constant 0 : index
    %c0_0 = arith.constant 0 : index
    %0 = vector.load %arg1[%c0, %c0_0] : memref<32x48xf32, #tpu.memory_space<vmem>>, vector<32x48xf32>
    %c0_1 = arith.constant 0 : index
    %c0_2 = arith.constant 0 : index
    %1 = vector.load %arg2[%c0_1, %c0_2] : memref<2x16xf32, #tpu.memory_space<vmem>>, vector<2x16xf32>
    %c0_3 = arith.constant 0 : index
    %c0_4 = arith.constant 0 : index
    %2 = vector.load %arg3[%c0_3, %c0_4] : memref<64x32xbf16, #tpu.memory_space<vmem>>, vector<64x32xbf16>
    %3 = arith.truncf %0 : vector<32x48xf32> to vector<32x48xbf16>
    %cst = arith.constant dense<0.000000e+00> : vector<64x48xf32>
    %4 = tpu.matmul %2, %3, %cst {dimension_numbers = #tpu.dot_dimension_numbers<[1], [0], [0], [1], [0, 0, 1, 1], [], []>} : vector<64x32xbf16>, vector<32x48xbf16>, vector<64x48xf32> -> vector<64x48xf32>
    %5 = vector.extract_strided_slice %4 {offsets = [0, 0], sizes = [16, 48], strides = [1, 1]} : vector<64x48xf32> to vector<16x48xf32>
    %6 = arith.truncf %5 : vector<16x48xf32> to vector<16x48xbf16>
    %c0_5 = arith.constant 0 : index
    %c0_6 = arith.constant 0 : index
    %7 = vector.load %arg4[%c0_5, %c0_6] : memref<192x64xbf16, #tpu.memory_space<vmem>>, vector<48x64xbf16>
    %cst_7 = arith.constant dense<0.000000e+00> : vector<16x64xf32>
    %8 = tpu.matmul %6, %7, %cst_7 {dimension_numbers = #tpu.dot_dimension_numbers<[1], [0], [0], [1], [0, 0, 1, 1], [], []>} : vector<16x48xbf16>, vector<48x64xbf16>, vector<16x64xf32> -> vector<16x64xf32>
    %9 = vector.extract_strided_slice %4 {offsets = [16, 0], sizes = [16, 48], strides = [1, 1]} : vector<64x48xf32> to vector<16x48xf32>
    %10 = arith.truncf %9 : vector<16x48xf32> to vector<16x48xbf16>
    %c48 = arith.constant 48 : index
    %c0_8 = arith.constant 0 : index
    %11 = vector.load %arg4[%c48, %c0_8] : memref<192x64xbf16, #tpu.memory_space<vmem>>, vector<48x64xbf16>
    %cst_9 = arith.constant dense<0.000000e+00> : vector<16x64xf32>
    %12 = tpu.matmul %10, %11, %cst_9 {dimension_numbers = #tpu.dot_dimension_numbers<[1], [0], [0], [1], [0, 0, 1, 1], [], []>} : vector<16x48xbf16>, vector<48x64xbf16>, vector<16x64xf32> -> vector<16x64xf32>
    %13 = arith.addf %8, %12 : vector<16x64xf32>
    %14 = vector.extract_strided_slice %4 {offsets = [32, 0], sizes = [16, 48], strides = [1, 1]} : vector<64x48xf32> to vector<16x48xf32>
    %15 = arith.truncf %14 : vector<16x48xf32> to vector<16x48xbf16>
    %c96 = arith.constant 96 : index
    %c0_10 = arith.constant 0 : index
    %16 = vector.load %arg4[%c96, %c0_10] : memref<192x64xbf16, #tpu.memory_space<vmem>>, vector<48x64xbf16>
    %cst_11 = arith.constant dense<0.000000e+00> : vector<16x64xf32>
    %17 = tpu.matmul %15, %16, %cst_11 {dimension_numbers = #tpu.dot_dimension_numbers<[1], [0], [0], [1], [0, 0, 1, 1], [], []>} : vector<16x48xbf16>, vector<48x64xbf16>, vector<16x64xf32> -> vector<16x64xf32>
    %18 = arith.addf %13, %17 : vector<16x64xf32>
    %19 = vector.extract_strided_slice %4 {offsets = [48, 0], sizes = [16, 48], strides = [1, 1]} : vector<64x48xf32> to vector<16x48xf32>
    %20 = arith.truncf %19 : vector<16x48xf32> to vector<16x48xbf16>
    %c144 = arith.constant 144 : index
    %c0_12 = arith.constant 0 : index
    %21 = vector.load %arg4[%c144, %c0_12] : memref<192x64xbf16, #tpu.memory_space<vmem>>, vector<48x64xbf16>
    %cst_13 = arith.constant dense<0.000000e+00> : vector<16x64xf32>
    %22 = tpu.matmul %20, %21, %cst_13 {dimension_numbers = #tpu.dot_dimension_numbers<[1], [0], [0], [1], [0, 0, 1, 1], [], []>} : vector<16x48xbf16>, vector<48x64xbf16>, vector<16x64xf32> -> vector<16x64xf32>
    %23 = arith.addf %18, %22 : vector<16x64xf32>
    %cst_14 = arith.constant 2.000000e-01 : f32
    %24 = vector.broadcast %cst_14 : f32 to vector<16x64xf32>
    %25 = arith.mulf %24, %23 : vector<16x64xf32>
    %26 = arith.maximumf %23, %25 : vector<16x64xf32>
    %c0_15 = arith.constant 0 : index
    %c0_16 = arith.constant 0 : index
    %27 = vector.load %arg5[%c0_15, %c0_16] : memref<32x16xbf16, #tpu.memory_space<vmem>>, vector<32x16xbf16>
    %28 = arith.truncf %26 : vector<16x64xf32> to vector<16x64xbf16>
    %cst_17 = arith.constant dense<0.000000e+00> : vector<32x64xf32>
    %29 = tpu.matmul %27, %28, %cst_17 {dimension_numbers = #tpu.dot_dimension_numbers<[1], [0], [0], [1], [0, 0, 1, 1], [], []>} : vector<32x16xbf16>, vector<16x64xbf16>, vector<32x64xf32> -> vector<32x64xf32>
    %30 = vector.extract_strided_slice %29 {offsets = [0, 0], sizes = [8, 64], strides = [1, 1]} : vector<32x64xf32> to vector<8x64xf32>
    %31 = arith.truncf %30 : vector<8x64xf32> to vector<8x64xbf16>
    %c0_18 = arith.constant 0 : index
    %c0_19 = arith.constant 0 : index
    %32 = vector.load %arg6[%c0_18, %c0_19] : memref<256x64xbf16, #tpu.memory_space<vmem>>, vector<64x64xbf16>
    %cst_20 = arith.constant dense<0.000000e+00> : vector<8x64xf32>
    %33 = tpu.matmul %31, %32, %cst_20 {dimension_numbers = #tpu.dot_dimension_numbers<[1], [0], [0], [1], [0, 0, 1, 1], [], []>} : vector<8x64xbf16>, vector<64x64xbf16>, vector<8x64xf32> -> vector<8x64xf32>
    %34 = vector.extract_strided_slice %29 {offsets = [8, 0], sizes = [8, 64], strides = [1, 1]} : vector<32x64xf32> to vector<8x64xf32>
    %35 = arith.truncf %34 : vector<8x64xf32> to vector<8x64xbf16>
    %c64 = arith.constant 64 : index
    %c0_21 = arith.constant 0 : index
    %36 = vector.load %arg6[%c64, %c0_21] : memref<256x64xbf16, #tpu.memory_space<vmem>>, vector<64x64xbf16>
    %cst_22 = arith.constant dense<0.000000e+00> : vector<8x64xf32>
    %37 = tpu.matmul %35, %36, %cst_22 {dimension_numbers = #tpu.dot_dimension_numbers<[1], [0], [0], [1], [0, 0, 1, 1], [], []>} : vector<8x64xbf16>, vector<64x64xbf16>, vector<8x64xf32> -> vector<8x64xf32>
    %38 = arith.addf %33, %37 : vector<8x64xf32>
    %39 = vector.extract_strided_slice %29 {offsets = [16, 0], sizes = [8, 64], strides = [1, 1]} : vector<32x64xf32> to vector<8x64xf32>
    %40 = arith.truncf %39 : vector<8x64xf32> to vector<8x64xbf16>
    %c128 = arith.constant 128 : index
    %c0_23 = arith.constant 0 : index
    %41 = vector.load %arg6[%c128, %c0_23] : memref<256x64xbf16, #tpu.memory_space<vmem>>, vector<64x64xbf16>
    %cst_24 = arith.constant dense<0.000000e+00> : vector<8x64xf32>
    %42 = tpu.matmul %40, %41, %cst_24 {dimension_numbers = #tpu.dot_dimension_numbers<[1], [0], [0], [1], [0, 0, 1, 1], [], []>} : vector<8x64xbf16>, vector<64x64xbf16>, vector<8x64xf32> -> vector<8x64xf32>
    %43 = arith.addf %38, %42 : vector<8x64xf32>
    %44 = vector.extract_strided_slice %29 {offsets = [24, 0], sizes = [8, 64], strides = [1, 1]} : vector<32x64xf32> to vector<8x64xf32>
    %45 = arith.truncf %44 : vector<8x64xf32> to vector<8x64xbf16>
    %c192 = arith.constant 192 : index
    %c0_25 = arith.constant 0 : index
    %46 = vector.load %arg6[%c192, %c0_25] : memref<256x64xbf16, #tpu.memory_space<vmem>>, vector<64x64xbf16>
    %cst_26 = arith.constant dense<0.000000e+00> : vector<8x64xf32>
    %47 = tpu.matmul %45, %46, %cst_26 {dimension_numbers = #tpu.dot_dimension_numbers<[1], [0], [0], [1], [0, 0, 1, 1], [], []>} : vector<8x64xbf16>, vector<64x64xbf16>, vector<8x64xf32> -> vector<8x64xf32>
    %48 = arith.addf %43, %47 : vector<8x64xf32>
    %49 = arith.mulf %48, %48 : vector<8x64xf32>
    %50 = tpu.concatenate %48, %49 in 0 : vector<8x64xf32>, vector<8x64xf32> -> vector<16x64xf32>
    %c0_27 = arith.constant 0 : index
    %c0_28 = arith.constant 0 : index
    %51 = vector.load %arg7[%c0_27, %c0_28] : memref<64x16xbf16, #tpu.memory_space<vmem>>, vector<64x16xbf16>
    %cst_29 = arith.constant dense<0.000000e+00> : vector<16x16xf32>
    %52 = tpu.matmul %50, %51, %cst_29 {dimension_numbers = #tpu.dot_dimension_numbers<[1], [0], [0], [1], [0, 0, 1, 1], [], []>} : vector<16x64xf32>, vector<64x16xbf16>, vector<16x16xf32> -> vector<16x16xf32>
    %53 = vector.extract_strided_slice %52 {offsets = [0, 0], sizes = [8, 16], strides = [1, 1]} : vector<16x16xf32> to vector<8x16xf32>
    %cst_30 = arith.constant dense<0.000000e+00> : vector<16xf32>
    %54 = vector.multi_reduction <add>, %53, %cst_30 [0] : vector<8x16xf32> to vector<16xf32>
    %55 = vector.shape_cast %54 : vector<16xf32> to vector<1x16xf32>
    %56 = vector.extract_strided_slice %52 {offsets = [8, 0], sizes = [8, 16], strides = [1, 1]} : vector<16x16xf32> to vector<8x16xf32>
    %cst_31 = arith.constant dense<0.000000e+00> : vector<16xf32>
    %57 = vector.multi_reduction <add>, %56, %cst_31 [0] : vector<8x16xf32> to vector<16xf32>
    %58 = vector.shape_cast %57 : vector<16xf32> to vector<1x16xf32>
    %59 = arith.mulf %55, %55 : vector<1x16xf32>
    %60 = arith.subf %58, %59 : vector<1x16xf32>
    %cst_32 = arith.constant 0.000000e+00 : f32
    %61 = vector.broadcast %cst_32 : f32 to vector<1x16xf32>
    %62 = arith.maximumf %60, %61 : vector<1x16xf32>
    %cst_33 = arith.constant 9.99999974E-6 : f32
    %63 = vector.broadcast %cst_33 : f32 to vector<1x16xf32>
    %64 = arith.addf %62, %63 : vector<1x16xf32>
    %65 = math.rsqrt %64 : vector<1x16xf32>
    %c0_34 = arith.constant 0 : index
    %c0_35 = arith.constant 0 : index
    %66 = vector.load %arg9[%c0_34, %c0_35] : memref<2x16xf32, #tpu.memory_space<vmem>>, vector<1x16xf32>
    %67 = arith.mulf %65, %66 : vector<1x16xf32>
    %c1 = arith.constant 1 : index
    %c0_36 = arith.constant 0 : index
    %68 = vector.load %arg9[%c1, %c0_36] : memref<2x16xf32, #tpu.memory_space<vmem>>, vector<1x16xf32>
    %69 = arith.mulf %55, %67 : vector<1x16xf32>
    %70 = arith.subf %68, %69 : vector<1x16xf32>
    %71 = tpu.concatenate %67, %70 in 0 : vector<1x16xf32>, vector<1x16xf32> -> vector<2x16xf32>
    %c0_37 = arith.constant 0 : index
    %c0_38 = arith.constant 0 : index
    %72 = vector.load %arg8[%c0_37, %c0_38] : memref<16x64xbf16, #tpu.memory_space<vmem>>, vector<16x64xbf16>
    %cst_39 = arith.constant dense<0.000000e+00> : vector<2x64xf32>
    %73 = tpu.matmul %71, %72, %cst_39 {dimension_numbers = #tpu.dot_dimension_numbers<[1], [0], [0], [1], [0, 0, 1, 1], [], []>} : vector<2x16xf32>, vector<16x64xbf16>, vector<2x64xf32> -> vector<2x64xf32>
    %74 = vector.extract_strided_slice %73 {offsets = [0, 0], sizes = [1, 64], strides = [1, 1]} : vector<2x64xf32> to vector<1x64xf32>
    %75 = vector.broadcast %74 : vector<1x64xf32> to vector<8x64xf32>
    %76 = arith.mulf %48, %75 : vector<8x64xf32>
    %77 = vector.extract_strided_slice %73 {offsets = [1, 0], sizes = [1, 64], strides = [1, 1]} : vector<2x64xf32> to vector<1x64xf32>
    %78 = vector.broadcast %77 : vector<1x64xf32> to vector<8x64xf32>
    %79 = arith.addf %76, %78 : vector<8x64xf32>
    %cst_40 = arith.constant 2.000000e-01 : f32
    %80 = vector.broadcast %cst_40 : f32 to vector<8x64xf32>
    %81 = arith.mulf %80, %79 : vector<8x64xf32>
    %82 = arith.maximumf %79, %81 : vector<8x64xf32>
    %c0_41 = arith.constant 0 : index
    %c0_42 = arith.constant 0 : index
    %83 = vector.load %arg10[%c0_41, %c0_42] : memref<8x8xbf16, #tpu.memory_space<vmem>>, vector<8x8xbf16>
    %84 = arith.truncf %82 : vector<8x64xf32> to vector<8x64xbf16>
    %cst_43 = arith.constant dense<0.000000e+00> : vector<8x64xf32>
    %85 = tpu.matmul %83, %84, %cst_43 {dimension_numbers = #tpu.dot_dimension_numbers<[1], [0], [0], [1], [0, 0, 1, 1], [], []>} : vector<8x8xbf16>, vector<8x64xbf16>, vector<8x64xf32> -> vector<8x64xf32>
    %86 = vector.extract_strided_slice %85 {offsets = [0, 0], sizes = [2, 64], strides = [1, 1]} : vector<8x64xf32> to vector<2x64xf32>
    %87 = arith.truncf %86 : vector<2x64xf32> to vector<2x64xbf16>
    %c0_44 = arith.constant 0 : index
    %c0_45 = arith.constant 0 : index
    %88 = vector.load %arg11[%c0_44, %c0_45] : memref<256x32xbf16, #tpu.memory_space<vmem>>, vector<64x32xbf16>
    %cst_46 = arith.constant dense<0.000000e+00> : vector<2x32xf32>
    %89 = tpu.matmul %87, %88, %cst_46 {dimension_numbers = #tpu.dot_dimension_numbers<[1], [0], [0], [1], [0, 0, 1, 1], [], []>} : vector<2x64xbf16>, vector<64x32xbf16>, vector<2x32xf32> -> vector<2x32xf32>
    %90 = vector.extract_strided_slice %85 {offsets = [2, 0], sizes = [2, 64], strides = [1, 1]} : vector<8x64xf32> to vector<2x64xf32>
    %91 = arith.truncf %90 : vector<2x64xf32> to vector<2x64xbf16>
    %c64_47 = arith.constant 64 : index
    %c0_48 = arith.constant 0 : index
    %92 = vector.load %arg11[%c64_47, %c0_48] : memref<256x32xbf16, #tpu.memory_space<vmem>>, vector<64x32xbf16>
    %cst_49 = arith.constant dense<0.000000e+00> : vector<2x32xf32>
    %93 = tpu.matmul %91, %92, %cst_49 {dimension_numbers = #tpu.dot_dimension_numbers<[1], [0], [0], [1], [0, 0, 1, 1], [], []>} : vector<2x64xbf16>, vector<64x32xbf16>, vector<2x32xf32> -> vector<2x32xf32>
    %94 = arith.addf %89, %93 : vector<2x32xf32>
    %95 = vector.extract_strided_slice %85 {offsets = [4, 0], sizes = [2, 64], strides = [1, 1]} : vector<8x64xf32> to vector<2x64xf32>
    %96 = arith.truncf %95 : vector<2x64xf32> to vector<2x64xbf16>
    %c128_50 = arith.constant 128 : index
    %c0_51 = arith.constant 0 : index
    %97 = vector.load %arg11[%c128_50, %c0_51] : memref<256x32xbf16, #tpu.memory_space<vmem>>, vector<64x32xbf16>
    %cst_52 = arith.constant dense<0.000000e+00> : vector<2x32xf32>
    %98 = tpu.matmul %96, %97, %cst_52 {dimension_numbers = #tpu.dot_dimension_numbers<[1], [0], [0], [1], [0, 0, 1, 1], [], []>} : vector<2x64xbf16>, vector<64x32xbf16>, vector<2x32xf32> -> vector<2x32xf32>
    %99 = arith.addf %94, %98 : vector<2x32xf32>
    %100 = vector.extract_strided_slice %85 {offsets = [6, 0], sizes = [2, 64], strides = [1, 1]} : vector<8x64xf32> to vector<2x64xf32>
    %101 = arith.truncf %100 : vector<2x64xf32> to vector<2x64xbf16>
    %c192_53 = arith.constant 192 : index
    %c0_54 = arith.constant 0 : index
    %102 = vector.load %arg11[%c192_53, %c0_54] : memref<256x32xbf16, #tpu.memory_space<vmem>>, vector<64x32xbf16>
    %cst_55 = arith.constant dense<0.000000e+00> : vector<2x32xf32>
    %103 = tpu.matmul %101, %102, %cst_55 {dimension_numbers = #tpu.dot_dimension_numbers<[1], [0], [0], [1], [0, 0, 1, 1], [], []>} : vector<2x64xbf16>, vector<64x32xbf16>, vector<2x32xf32> -> vector<2x32xf32>
    %104 = arith.addf %99, %103 : vector<2x32xf32>
    %c0_56 = arith.constant 0 : index
    %c0_57 = arith.constant 0 : index
    %105 = vector.load %arg12[%c0_56, %c0_57] : memref<1x32xf32, #tpu.memory_space<vmem>>, vector<1x32xf32>
    %106 = vector.broadcast %105 : vector<1x32xf32> to vector<2x32xf32>
    %107 = arith.addf %104, %106 : vector<2x32xf32>
    %108 = vector.extract_strided_slice %107 {offsets = [0, 0], sizes = [2, 16], strides = [1, 1]} : vector<2x32xf32> to vector<2x16xf32>
    %109 = vector.extract_strided_slice %107 {offsets = [0, 16], sizes = [2, 16], strides = [1, 1]} : vector<2x32xf32> to vector<2x16xf32>
    %cst_58 = arith.constant 5.000000e-01 : f32
    %110 = vector.broadcast %cst_58 : f32 to vector<2x16xf32>
    %111 = arith.mulf %110, %109 : vector<2x16xf32>
    %112 = math.exp %111 : vector<2x16xf32>
    %113 = arith.mulf %1, %112 : vector<2x16xf32>
    %114 = arith.addf %113, %108 : vector<2x16xf32>
    %c0_59 = arith.constant 0 : index
    %c0_60 = arith.constant 0 : index
    %115 = vector.load %arg13[%c0_59, %c0_60] : memref<32x2xbf16, #tpu.memory_space<vmem>>, vector<32x2xbf16>
    %116 = arith.truncf %114 : vector<2x16xf32> to vector<2x16xbf16>
    %cst_61 = arith.constant dense<0.000000e+00> : vector<32x16xf32>
    %117 = tpu.matmul %115, %116, %cst_61 {dimension_numbers = #tpu.dot_dimension_numbers<[1], [0], [0], [1], [0, 0, 1, 1], [], []>} : vector<32x2xbf16>, vector<2x16xbf16>, vector<32x16xf32> -> vector<32x16xf32>
    %118 = vector.extract_strided_slice %117 {offsets = [0, 0], sizes = [8, 16], strides = [1, 1]} : vector<32x16xf32> to vector<8x16xf32>
    %119 = arith.truncf %118 : vector<8x16xf32> to vector<8x16xbf16>
    %c0_62 = arith.constant 0 : index
    %c0_63 = arith.constant 0 : index
    %120 = vector.load %arg14[%c0_62, %c0_63] : memref<64x64xbf16, #tpu.memory_space<vmem>>, vector<16x64xbf16>
    %cst_64 = arith.constant dense<0.000000e+00> : vector<8x64xf32>
    %121 = tpu.matmul %119, %120, %cst_64 {dimension_numbers = #tpu.dot_dimension_numbers<[1], [0], [0], [1], [0, 0, 1, 1], [], []>} : vector<8x16xbf16>, vector<16x64xbf16>, vector<8x64xf32> -> vector<8x64xf32>
    %122 = vector.extract_strided_slice %117 {offsets = [8, 0], sizes = [8, 16], strides = [1, 1]} : vector<32x16xf32> to vector<8x16xf32>
    %123 = arith.truncf %122 : vector<8x16xf32> to vector<8x16xbf16>
    %c16 = arith.constant 16 : index
    %c0_65 = arith.constant 0 : index
    %124 = vector.load %arg14[%c16, %c0_65] : memref<64x64xbf16, #tpu.memory_space<vmem>>, vector<16x64xbf16>
    %cst_66 = arith.constant dense<0.000000e+00> : vector<8x64xf32>
    %125 = tpu.matmul %123, %124, %cst_66 {dimension_numbers = #tpu.dot_dimension_numbers<[1], [0], [0], [1], [0, 0, 1, 1], [], []>} : vector<8x16xbf16>, vector<16x64xbf16>, vector<8x64xf32> -> vector<8x64xf32>
    %126 = arith.addf %121, %125 : vector<8x64xf32>
    %127 = vector.extract_strided_slice %117 {offsets = [16, 0], sizes = [8, 16], strides = [1, 1]} : vector<32x16xf32> to vector<8x16xf32>
    %128 = arith.truncf %127 : vector<8x16xf32> to vector<8x16xbf16>
    %c32 = arith.constant 32 : index
    %c0_67 = arith.constant 0 : index
    %129 = vector.load %arg14[%c32, %c0_67] : memref<64x64xbf16, #tpu.memory_space<vmem>>, vector<16x64xbf16>
    %cst_68 = arith.constant dense<0.000000e+00> : vector<8x64xf32>
    %130 = tpu.matmul %128, %129, %cst_68 {dimension_numbers = #tpu.dot_dimension_numbers<[1], [0], [0], [1], [0, 0, 1, 1], [], []>} : vector<8x16xbf16>, vector<16x64xbf16>, vector<8x64xf32> -> vector<8x64xf32>
    %131 = arith.addf %126, %130 : vector<8x64xf32>
    %132 = vector.extract_strided_slice %117 {offsets = [24, 0], sizes = [8, 16], strides = [1, 1]} : vector<32x16xf32> to vector<8x16xf32>
    %133 = arith.truncf %132 : vector<8x16xf32> to vector<8x16xbf16>
    %c48_69 = arith.constant 48 : index
    %c0_70 = arith.constant 0 : index
    %134 = vector.load %arg14[%c48_69, %c0_70] : memref<64x64xbf16, #tpu.memory_space<vmem>>, vector<16x64xbf16>
    %cst_71 = arith.constant dense<0.000000e+00> : vector<8x64xf32>
    %135 = tpu.matmul %133, %134, %cst_71 {dimension_numbers = #tpu.dot_dimension_numbers<[1], [0], [0], [1], [0, 0, 1, 1], [], []>} : vector<8x16xbf16>, vector<16x64xbf16>, vector<8x64xf32> -> vector<8x64xf32>
    %136 = arith.addf %131, %135 : vector<8x64xf32>
    %137 = arith.mulf %136, %136 : vector<8x64xf32>
    %138 = tpu.concatenate %136, %137 in 0 : vector<8x64xf32>, vector<8x64xf32> -> vector<16x64xf32>
    %c0_72 = arith.constant 0 : index
    %c0_73 = arith.constant 0 : index
    %139 = vector.load %arg15[%c0_72, %c0_73] : memref<64x16xbf16, #tpu.memory_space<vmem>>, vector<64x16xbf16>
    %cst_74 = arith.constant dense<0.000000e+00> : vector<16x16xf32>
    %140 = tpu.matmul %138, %139, %cst_74 {dimension_numbers = #tpu.dot_dimension_numbers<[1], [0], [0], [1], [0, 0, 1, 1], [], []>} : vector<16x64xf32>, vector<64x16xbf16>, vector<16x16xf32> -> vector<16x16xf32>
    %141 = vector.extract_strided_slice %140 {offsets = [0, 0], sizes = [8, 16], strides = [1, 1]} : vector<16x16xf32> to vector<8x16xf32>
    %cst_75 = arith.constant dense<0.000000e+00> : vector<16xf32>
    %142 = vector.multi_reduction <add>, %141, %cst_75 [0] : vector<8x16xf32> to vector<16xf32>
    %143 = vector.shape_cast %142 : vector<16xf32> to vector<1x16xf32>
    %144 = vector.extract_strided_slice %140 {offsets = [8, 0], sizes = [8, 16], strides = [1, 1]} : vector<16x16xf32> to vector<8x16xf32>
    %cst_76 = arith.constant dense<0.000000e+00> : vector<16xf32>
    %145 = vector.multi_reduction <add>, %144, %cst_76 [0] : vector<8x16xf32> to vector<16xf32>
    %146 = vector.shape_cast %145 : vector<16xf32> to vector<1x16xf32>
    %147 = arith.mulf %143, %143 : vector<1x16xf32>
    %148 = arith.subf %146, %147 : vector<1x16xf32>
    %cst_77 = arith.constant 0.000000e+00 : f32
    %149 = vector.broadcast %cst_77 : f32 to vector<1x16xf32>
    %150 = arith.maximumf %148, %149 : vector<1x16xf32>
    %cst_78 = arith.constant 9.99999974E-6 : f32
    %151 = vector.broadcast %cst_78 : f32 to vector<1x16xf32>
    %152 = arith.addf %150, %151 : vector<1x16xf32>
    %153 = math.rsqrt %152 : vector<1x16xf32>
    %c0_79 = arith.constant 0 : index
    %c0_80 = arith.constant 0 : index
    %154 = vector.load %arg17[%c0_79, %c0_80] : memref<2x16xf32, #tpu.memory_space<vmem>>, vector<1x16xf32>
    %155 = arith.mulf %153, %154 : vector<1x16xf32>
    %c1_81 = arith.constant 1 : index
    %c0_82 = arith.constant 0 : index
    %156 = vector.load %arg17[%c1_81, %c0_82] : memref<2x16xf32, #tpu.memory_space<vmem>>, vector<1x16xf32>
    %157 = arith.mulf %143, %155 : vector<1x16xf32>
    %158 = arith.subf %156, %157 : vector<1x16xf32>
    %159 = tpu.concatenate %155, %158 in 0 : vector<1x16xf32>, vector<1x16xf32> -> vector<2x16xf32>
    %c0_83 = arith.constant 0 : index
    %c0_84 = arith.constant 0 : index
    %160 = vector.load %arg16[%c0_83, %c0_84] : memref<16x64xbf16, #tpu.memory_space<vmem>>, vector<16x64xbf16>
    %cst_85 = arith.constant dense<0.000000e+00> : vector<2x64xf32>
    %161 = tpu.matmul %159, %160, %cst_85 {dimension_numbers = #tpu.dot_dimension_numbers<[1], [0], [0], [1], [0, 0, 1, 1], [], []>} : vector<2x16xf32>, vector<16x64xbf16>, vector<2x64xf32> -> vector<2x64xf32>
    %162 = vector.extract_strided_slice %161 {offsets = [0, 0], sizes = [1, 64], strides = [1, 1]} : vector<2x64xf32> to vector<1x64xf32>
    %163 = vector.broadcast %162 : vector<1x64xf32> to vector<8x64xf32>
    %164 = arith.mulf %136, %163 : vector<8x64xf32>
    %165 = vector.extract_strided_slice %161 {offsets = [1, 0], sizes = [1, 64], strides = [1, 1]} : vector<2x64xf32> to vector<1x64xf32>
    %166 = vector.broadcast %165 : vector<1x64xf32> to vector<8x64xf32>
    %167 = arith.addf %164, %166 : vector<8x64xf32>
    %cst_86 = arith.constant 2.000000e-01 : f32
    %168 = vector.broadcast %cst_86 : f32 to vector<8x64xf32>
    %169 = arith.mulf %168, %167 : vector<8x64xf32>
    %170 = arith.maximumf %167, %169 : vector<8x64xf32>
    %c0_87 = arith.constant 0 : index
    %c0_88 = arith.constant 0 : index
    %171 = vector.load %arg18[%c0_87, %c0_88] : memref<64x8xbf16, #tpu.memory_space<vmem>>, vector<64x8xbf16>
    %172 = arith.truncf %170 : vector<8x64xf32> to vector<8x64xbf16>
    %cst_89 = arith.constant dense<0.000000e+00> : vector<64x64xf32>
    %173 = tpu.matmul %171, %172, %cst_89 {dimension_numbers = #tpu.dot_dimension_numbers<[1], [0], [0], [1], [0, 0, 1, 1], [], []>} : vector<64x8xbf16>, vector<8x64xbf16>, vector<64x64xf32> -> vector<64x64xf32>
    %174 = vector.extract_strided_slice %173 {offsets = [0, 0], sizes = [16, 64], strides = [1, 1]} : vector<64x64xf32> to vector<16x64xf32>
    %175 = arith.truncf %174 : vector<16x64xf32> to vector<16x64xbf16>
    %c0_90 = arith.constant 0 : index
    %c0_91 = arith.constant 0 : index
    %176 = vector.load %arg19[%c0_90, %c0_91] : memref<256x64xbf16, #tpu.memory_space<vmem>>, vector<64x64xbf16>
    %cst_92 = arith.constant dense<0.000000e+00> : vector<16x64xf32>
    %177 = tpu.matmul %175, %176, %cst_92 {dimension_numbers = #tpu.dot_dimension_numbers<[1], [0], [0], [1], [0, 0, 1, 1], [], []>} : vector<16x64xbf16>, vector<64x64xbf16>, vector<16x64xf32> -> vector<16x64xf32>
    %178 = vector.extract_strided_slice %173 {offsets = [16, 0], sizes = [16, 64], strides = [1, 1]} : vector<64x64xf32> to vector<16x64xf32>
    %179 = arith.truncf %178 : vector<16x64xf32> to vector<16x64xbf16>
    %c64_93 = arith.constant 64 : index
    %c0_94 = arith.constant 0 : index
    %180 = vector.load %arg19[%c64_93, %c0_94] : memref<256x64xbf16, #tpu.memory_space<vmem>>, vector<64x64xbf16>
    %cst_95 = arith.constant dense<0.000000e+00> : vector<16x64xf32>
    %181 = tpu.matmul %179, %180, %cst_95 {dimension_numbers = #tpu.dot_dimension_numbers<[1], [0], [0], [1], [0, 0, 1, 1], [], []>} : vector<16x64xbf16>, vector<64x64xbf16>, vector<16x64xf32> -> vector<16x64xf32>
    %182 = arith.addf %177, %181 : vector<16x64xf32>
    %183 = vector.extract_strided_slice %173 {offsets = [32, 0], sizes = [16, 64], strides = [1, 1]} : vector<64x64xf32> to vector<16x64xf32>
    %184 = arith.truncf %183 : vector<16x64xf32> to vector<16x64xbf16>
    %c128_96 = arith.constant 128 : index
    %c0_97 = arith.constant 0 : index
    %185 = vector.load %arg19[%c128_96, %c0_97] : memref<256x64xbf16, #tpu.memory_space<vmem>>, vector<64x64xbf16>
    %cst_98 = arith.constant dense<0.000000e+00> : vector<16x64xf32>
    %186 = tpu.matmul %184, %185, %cst_98 {dimension_numbers = #tpu.dot_dimension_numbers<[1], [0], [0], [1], [0, 0, 1, 1], [], []>} : vector<16x64xbf16>, vector<64x64xbf16>, vector<16x64xf32> -> vector<16x64xf32>
    %187 = arith.addf %182, %186 : vector<16x64xf32>
    %188 = vector.extract_strided_slice %173 {offsets = [48, 0], sizes = [16, 64], strides = [1, 1]} : vector<64x64xf32> to vector<16x64xf32>
    %189 = arith.truncf %188 : vector<16x64xf32> to vector<16x64xbf16>
    %c192_99 = arith.constant 192 : index
    %c0_100 = arith.constant 0 : index
    %190 = vector.load %arg19[%c192_99, %c0_100] : memref<256x64xbf16, #tpu.memory_space<vmem>>, vector<64x64xbf16>
    %cst_101 = arith.constant dense<0.000000e+00> : vector<16x64xf32>
    %191 = tpu.matmul %189, %190, %cst_101 {dimension_numbers = #tpu.dot_dimension_numbers<[1], [0], [0], [1], [0, 0, 1, 1], [], []>} : vector<16x64xbf16>, vector<64x64xbf16>, vector<16x64xf32> -> vector<16x64xf32>
    %192 = arith.addf %187, %191 : vector<16x64xf32>
    %193 = arith.mulf %192, %192 : vector<16x64xf32>
    %194 = tpu.concatenate %192, %193 in 0 : vector<16x64xf32>, vector<16x64xf32> -> vector<32x64xf32>
    %c0_102 = arith.constant 0 : index
    %c0_103 = arith.constant 0 : index
    %195 = vector.load %arg20[%c0_102, %c0_103] : memref<64x8xbf16, #tpu.memory_space<vmem>>, vector<64x8xbf16>
    %cst_104 = arith.constant dense<0.000000e+00> : vector<32x8xf32>
    %196 = tpu.matmul %194, %195, %cst_104 {dimension_numbers = #tpu.dot_dimension_numbers<[1], [0], [0], [1], [0, 0, 1, 1], [], []>} : vector<32x64xf32>, vector<64x8xbf16>, vector<32x8xf32> -> vector<32x8xf32>
    %197 = vector.extract_strided_slice %196 {offsets = [0, 0], sizes = [16, 8], strides = [1, 1]} : vector<32x8xf32> to vector<16x8xf32>
    %cst_105 = arith.constant dense<0.000000e+00> : vector<8xf32>
    %198 = vector.multi_reduction <add>, %197, %cst_105 [0] : vector<16x8xf32> to vector<8xf32>
    %199 = vector.shape_cast %198 : vector<8xf32> to vector<1x8xf32>
    %200 = vector.extract_strided_slice %196 {offsets = [16, 0], sizes = [16, 8], strides = [1, 1]} : vector<32x8xf32> to vector<16x8xf32>
    %cst_106 = arith.constant dense<0.000000e+00> : vector<8xf32>
    %201 = vector.multi_reduction <add>, %200, %cst_106 [0] : vector<16x8xf32> to vector<8xf32>
    %202 = vector.shape_cast %201 : vector<8xf32> to vector<1x8xf32>
    %203 = arith.mulf %199, %199 : vector<1x8xf32>
    %204 = arith.subf %202, %203 : vector<1x8xf32>
    %cst_107 = arith.constant 0.000000e+00 : f32
    %205 = vector.broadcast %cst_107 : f32 to vector<1x8xf32>
    %206 = arith.maximumf %204, %205 : vector<1x8xf32>
    %cst_108 = arith.constant 9.99999974E-6 : f32
    %207 = vector.broadcast %cst_108 : f32 to vector<1x8xf32>
    %208 = arith.addf %206, %207 : vector<1x8xf32>
    %209 = math.rsqrt %208 : vector<1x8xf32>
    %c0_109 = arith.constant 0 : index
    %c0_110 = arith.constant 0 : index
    %210 = vector.load %arg22[%c0_109, %c0_110] : memref<2x8xf32, #tpu.memory_space<vmem>>, vector<1x8xf32>
    %211 = arith.mulf %209, %210 : vector<1x8xf32>
    %c1_111 = arith.constant 1 : index
    %c0_112 = arith.constant 0 : index
    %212 = vector.load %arg22[%c1_111, %c0_112] : memref<2x8xf32, #tpu.memory_space<vmem>>, vector<1x8xf32>
    %213 = arith.mulf %199, %211 : vector<1x8xf32>
    %214 = arith.subf %212, %213 : vector<1x8xf32>
    %215 = tpu.concatenate %211, %214 in 0 : vector<1x8xf32>, vector<1x8xf32> -> vector<2x8xf32>
    %c0_113 = arith.constant 0 : index
    %c0_114 = arith.constant 0 : index
    %216 = vector.load %arg21[%c0_113, %c0_114] : memref<8x64xbf16, #tpu.memory_space<vmem>>, vector<8x64xbf16>
    %cst_115 = arith.constant dense<0.000000e+00> : vector<2x64xf32>
    %217 = tpu.matmul %215, %216, %cst_115 {dimension_numbers = #tpu.dot_dimension_numbers<[1], [0], [0], [1], [0, 0, 1, 1], [], []>} : vector<2x8xf32>, vector<8x64xbf16>, vector<2x64xf32> -> vector<2x64xf32>
    %218 = vector.extract_strided_slice %217 {offsets = [0, 0], sizes = [1, 64], strides = [1, 1]} : vector<2x64xf32> to vector<1x64xf32>
    %219 = vector.broadcast %218 : vector<1x64xf32> to vector<16x64xf32>
    %220 = arith.mulf %192, %219 : vector<16x64xf32>
    %221 = vector.extract_strided_slice %217 {offsets = [1, 0], sizes = [1, 64], strides = [1, 1]} : vector<2x64xf32> to vector<1x64xf32>
    %222 = vector.broadcast %221 : vector<1x64xf32> to vector<16x64xf32>
    %223 = arith.addf %220, %222 : vector<16x64xf32>
    %cst_116 = arith.constant 2.000000e-01 : f32
    %224 = vector.broadcast %cst_116 : f32 to vector<16x64xf32>
    %225 = arith.mulf %224, %223 : vector<16x64xf32>
    %226 = arith.maximumf %223, %225 : vector<16x64xf32>
    %c0_117 = arith.constant 0 : index
    %c0_118 = arith.constant 0 : index
    %227 = vector.load %arg23[%c0_117, %c0_118] : memref<128x16xbf16, #tpu.memory_space<vmem>>, vector<128x16xbf16>
    %228 = arith.truncf %226 : vector<16x64xf32> to vector<16x64xbf16>
    %cst_119 = arith.constant dense<0.000000e+00> : vector<128x64xf32>
    %229 = tpu.matmul %227, %228, %cst_119 {dimension_numbers = #tpu.dot_dimension_numbers<[1], [0], [0], [1], [0, 0, 1, 1], [], []>} : vector<128x16xbf16>, vector<16x64xbf16>, vector<128x64xf32> -> vector<128x64xf32>
    %230 = vector.extract_strided_slice %229 {offsets = [0, 0], sizes = [32, 64], strides = [1, 1]} : vector<128x64xf32> to vector<32x64xf32>
    %231 = arith.truncf %230 : vector<32x64xf32> to vector<32x64xbf16>
    %c0_120 = arith.constant 0 : index
    %c0_121 = arith.constant 0 : index
    %232 = vector.load %arg24[%c0_120, %c0_121] : memref<256x48xbf16, #tpu.memory_space<vmem>>, vector<64x48xbf16>
    %cst_122 = arith.constant dense<0.000000e+00> : vector<32x48xf32>
    %233 = tpu.matmul %231, %232, %cst_122 {dimension_numbers = #tpu.dot_dimension_numbers<[1], [0], [0], [1], [0, 0, 1, 1], [], []>} : vector<32x64xbf16>, vector<64x48xbf16>, vector<32x48xf32> -> vector<32x48xf32>
    %234 = vector.extract_strided_slice %229 {offsets = [32, 0], sizes = [32, 64], strides = [1, 1]} : vector<128x64xf32> to vector<32x64xf32>
    %235 = arith.truncf %234 : vector<32x64xf32> to vector<32x64xbf16>
    %c64_123 = arith.constant 64 : index
    %c0_124 = arith.constant 0 : index
    %236 = vector.load %arg24[%c64_123, %c0_124] : memref<256x48xbf16, #tpu.memory_space<vmem>>, vector<64x48xbf16>
    %cst_125 = arith.constant dense<0.000000e+00> : vector<32x48xf32>
    %237 = tpu.matmul %235, %236, %cst_125 {dimension_numbers = #tpu.dot_dimension_numbers<[1], [0], [0], [1], [0, 0, 1, 1], [], []>} : vector<32x64xbf16>, vector<64x48xbf16>, vector<32x48xf32> -> vector<32x48xf32>
    %238 = arith.addf %233, %237 : vector<32x48xf32>
    %239 = vector.extract_strided_slice %229 {offsets = [64, 0], sizes = [32, 64], strides = [1, 1]} : vector<128x64xf32> to vector<32x64xf32>
    %240 = arith.truncf %239 : vector<32x64xf32> to vector<32x64xbf16>
    %c128_126 = arith.constant 128 : index
    %c0_127 = arith.constant 0 : index
    %241 = vector.load %arg24[%c128_126, %c0_127] : memref<256x48xbf16, #tpu.memory_space<vmem>>, vector<64x48xbf16>
    %cst_128 = arith.constant dense<0.000000e+00> : vector<32x48xf32>
    %242 = tpu.matmul %240, %241, %cst_128 {dimension_numbers = #tpu.dot_dimension_numbers<[1], [0], [0], [1], [0, 0, 1, 1], [], []>} : vector<32x64xbf16>, vector<64x48xbf16>, vector<32x48xf32> -> vector<32x48xf32>
    %243 = arith.addf %238, %242 : vector<32x48xf32>
    %244 = vector.extract_strided_slice %229 {offsets = [96, 0], sizes = [32, 64], strides = [1, 1]} : vector<128x64xf32> to vector<32x64xf32>
    %245 = arith.truncf %244 : vector<32x64xf32> to vector<32x64xbf16>
    %c192_129 = arith.constant 192 : index
    %c0_130 = arith.constant 0 : index
    %246 = vector.load %arg24[%c192_129, %c0_130] : memref<256x48xbf16, #tpu.memory_space<vmem>>, vector<64x48xbf16>
    %cst_131 = arith.constant dense<0.000000e+00> : vector<32x48xf32>
    %247 = tpu.matmul %245, %246, %cst_131 {dimension_numbers = #tpu.dot_dimension_numbers<[1], [0], [0], [1], [0, 0, 1, 1], [], []>} : vector<32x64xbf16>, vector<64x48xbf16>, vector<32x48xf32> -> vector<32x48xf32>
    %248 = arith.addf %243, %247 : vector<32x48xf32>
    %249 = math.tanh %248 : vector<32x48xf32>
    %c0_132 = arith.constant 0 : index
    %c0_133 = arith.constant 0 : index
    %250 = vector.load %arg25[%c0_132, %c0_133] : memref<32x48xf32, #tpu.memory_space<vmem>>, vector<32x48xf32>
    tpu.vector_store %arg25[%c0_132, %c0_133], %249 {strides = array<i32>} : memref<32x48xf32, #tpu.memory_space<vmem>>, vector<32x48xf32>,
    return
  }
  func.func @transform_0(%arg0: i32) -> (i32, i32) {
    %c0_i32 = arith.constant 0 : i32
    %c0_i32_0 = arith.constant 0 : i32
    %c0_i32_1 = arith.constant 0 : i32
    return %c0_i32, %c0_i32_0 : i32, i32
  }
  func.func @transform_1(%arg0: i32) -> (i32, i32) {
    %c0_i32 = arith.constant 0 : i32
    %c0_i32_0 = arith.constant 0 : i32
    %c0_i32_1 = arith.constant 0 : i32
    return %c0_i32, %c0_i32_0 : i32, i32
  }
  func.func @transform_2(%arg0: i32) -> (i32, i32) {
    %c0_i32 = arith.constant 0 : i32
    %c0_i32_0 = arith.constant 0 : i32
    %c0_i32_1 = arith.constant 0 : i32
    return %c0_i32, %c0_i32_0 : i32, i32
  }
  func.func @transform_3(%arg0: i32) -> (i32, i32) {
    %c0_i32 = arith.constant 0 : i32
    %c0_i32_0 = arith.constant 0 : i32
    %c0_i32_1 = arith.constant 0 : i32
    return %c0_i32, %c0_i32_0 : i32, i32
  }
  func.func @transform_4(%arg0: i32) -> (i32, i32) {
    %c0_i32 = arith.constant 0 : i32
    %c0_i32_0 = arith.constant 0 : i32
    %c0_i32_1 = arith.constant 0 : i32
    return %c0_i32, %c0_i32_0 : i32, i32
  }
  func.func @transform_5(%arg0: i32) -> (i32, i32) {
    %c0_i32 = arith.constant 0 : i32
    %c0_i32_0 = arith.constant 0 : i32
    %c0_i32_1 = arith.constant 0 : i32
    return %c0_i32, %c0_i32_0 : i32, i32
  }
  func.func @transform_6(%arg0: i32) -> (i32, i32) {
    %c0_i32 = arith.constant 0 : i32
    %c0_i32_0 = arith.constant 0 : i32
    %c0_i32_1 = arith.constant 0 : i32
    return %c0_i32, %c0_i32_0 : i32, i32
  }
  func.func @transform_7(%arg0: i32) -> (i32, i32) {
    %c0_i32 = arith.constant 0 : i32
    %c0_i32_0 = arith.constant 0 : i32
    %c0_i32_1 = arith.constant 0 : i32
    return %c0_i32, %c0_i32_0 : i32, i32
  }
  func.func @transform_8(%arg0: i32) -> (i32, i32) {
    %c0_i32 = arith.constant 0 : i32
    %c0_i32_0 = arith.constant 0 : i32
    %c0_i32_1 = arith.constant 0 : i32
    return %c0_i32, %c0_i32_0 : i32, i32
  }
  func.func @transform_9(%arg0: i32) -> (i32, i32) {
    %c0_i32 = arith.constant 0 : i32
    %c0_i32_0 = arith.constant 0 : i32
    %c0_i32_1 = arith.constant 0 : i32
    return %c0_i32, %c0_i32_0 : i32, i32
  }
  func.func @transform_10(%arg0: i32) -> (i32, i32) {
    %c0_i32 = arith.constant 0 : i32
    %c0_i32_0 = arith.constant 0 : i32
    %c0_i32_1 = arith.constant 0 : i32
    return %c0_i32, %c0_i32_0 : i32, i32
  }
  func.func @transform_11(%arg0: i32) -> (i32, i32) {
    %c0_i32 = arith.constant 0 : i32
    %c0_i32_0 = arith.constant 0 : i32
    %c0_i32_1 = arith.constant 0 : i32
    return %c0_i32, %c0_i32_0 : i32, i32
  }
  func.func @transform_12(%arg0: i32) -> (i32, i32) {
    %c0_i32 = arith.constant 0 : i32
    %c0_i32_0 = arith.constant 0 : i32
    %c0_i32_1 = arith.constant 0 : i32
    return %c0_i32, %c0_i32_0 : i32, i32
  }
  func.func @transform_13(%arg0: i32) -> (i32, i32) {
    %c0_i32 = arith.constant 0 : i32
    %c0_i32_0 = arith.constant 0 : i32
    %c0_i32_1 = arith.constant 0 : i32
    return %c0_i32, %c0_i32_0 : i32, i32
  }
  func.func @transform_14(%arg0: i32) -> (i32, i32) {
    %c0_i32 = arith.constant 0 : i32
    %c0_i32_0 = arith.constant 0 : i32
    %c0_i32_1 = arith.constant 0 : i32
    return %c0_i32, %c0_i32_0 : i32, i32
  }
  func.func @transform_15(%arg0: i32) -> (i32, i32) {
    %c0_i32 = arith.constant 0 : i32
    %c0_i32_0 = arith.constant 0 : i32
    %c0_i32_1 = arith.constant 0 : i32
    return %c0_i32, %c0_i32_0 : i32, i32
  }
  func.func @transform_16(%arg0: i32) -> (i32, i32) {
    %c0_i32 = arith.constant 0 : i32
    %c0_i32_0 = arith.constant 0 : i32
    %c0_i32_1 = arith.constant 0 : i32
    return %c0_i32, %c0_i32_0 : i32, i32
  }
  func.func @transform_17(%arg0: i32) -> (i32, i32) {
    %c0_i32 = arith.constant 0 : i32
    %c0_i32_0 = arith.constant 0 : i32
    %c0_i32_1 = arith.constant 0 : i32
    return %c0_i32, %c0_i32_0 : i32, i32
  }
  func.func @transform_18(%arg0: i32) -> (i32, i32) {
    %c0_i32 = arith.constant 0 : i32
    %c0_i32_0 = arith.constant 0 : i32
    %c0_i32_1 = arith.constant 0 : i32
    return %c0_i32, %c0_i32_0 : i32, i32
  }
  func.func @transform_19(%arg0: i32) -> (i32, i32) {
    %c0_i32 = arith.constant 0 : i32
    %c0_i32_0 = arith.constant 0 : i32
    %c0_i32_1 = arith.constant 0 : i32
    return %c0_i32, %c0_i32_0 : i32, i32
  }
  func.func @transform_20(%arg0: i32) -> (i32, i32) {
    %c0_i32 = arith.constant 0 : i32
    %c0_i32_0 = arith.constant 0 : i32
    %c0_i32_1 = arith.constant 0 : i32
    return %c0_i32, %c0_i32_0 : i32, i32
  }
  func.func @transform_21(%arg0: i32) -> (i32, i32) {
    %c0_i32 = arith.constant 0 : i32
    %c0_i32_0 = arith.constant 0 : i32
    %c0_i32_1 = arith.constant 0 : i32
    return %c0_i32, %c0_i32_0 : i32, i32
  }
  func.func @transform_22(%arg0: i32) -> (i32, i32) {
    %c0_i32 = arith.constant 0 : i32
    %c0_i32_0 = arith.constant 0 : i32
    %c0_i32_1 = arith.constant 0 : i32
    return %c0_i32, %c0_i32_0 : i32, i32
  }
  func.func @transform_23(%arg0: i32) -> (i32, i32) {
    %c0_i32 = arith.constant 0 : i32
    %c0_i32_0 = arith.constant 0 : i32
    %c0_i32_1 = arith.constant 0 : i32
    return %c0_i32, %c0_i32_0 : i32, i32
  }
  func.func @transform_24(%arg0: i32) -> (i32, i32) {
    %c0_i32 = arith.constant 0 : i32
    %c0_i32_0 = arith.constant 0 : i32
    %c0_i32_1 = arith.constant 0 : i32
    return %c0_i32, %c0_i32_0 : i32, i32
  }
}

</mosaic_0001>

<bundles_post_ra>
// kernel: forward.1
= control target key start
LH: loop header
LB: loop body
LE: loop exit
PB: predicated region body
PF: predicated region fallthrough
CT: control target
= control target key end

     0   :  { %v3917_v3 = vmov 0.0   ;;  %vm113_vm0 = vcmask 261120   ;;  %vm3918_vm1 = vmmov 0   ;;  %vm223_vm2 = vcmask 392192   ;;  %s4648_s0 = inlined_call_operand.vmem [shape: f32[32,48], index: 0, kind: input, shape index: {}]   ;;  %s4649_s2 = inlined_call_operand.vmem [shape: bf16[64,32], index: 2, kind: input, shape index: {}]   ;;  %s4650_s3 = inlined_call_operand.vmem [shape: bf16[192,64], index: 3, kind: input, shape index: {}]   ;;  %s4651_s4 = inlined_call_operand.vmem [shape: bf16[32,16], index: 4, kind: input, shape index: {}]   ;;  %s4652_s5 = inlined_call_operand.vmem [shape: bf16[256,64], index: 5, kind: input, shape index: {}]   ;;  %s4653_s6 = inlined_call_operand.vmem [shape: bf16[64,16], index: 6, kind: input, shape index: {}]   ;;  %s4654_s7 = inlined_call_operand.vmem [shape: bf16[16,64], index: 7, kind: input, shape index: {}]   ;;  %s4655_s8 = inlined_call_operand.vmem [shape: f32[2,16], index: 8, kind: input, shape index: {}]   ;;  %s4656_s10 = inlined_call_operand.vmem [shape: bf16[256,32], index: 10, kind: input, shape index: {}]   ;;  %s4657_s9 = inlined_call_operand.vmem [shape: bf16[8,8], index: 9, kind: input, shape index: {}]   ;;  %s4658_s11 = inlined_call_operand.vmem [shape: f32[1,32], index: 11, kind: input, shape index: {}]   ;;  %s4659_s12 = inlined_call_operand.vmem [shape: bf16[32,2], index: 12, kind: input, shape index: {}]   ;;  %s4660_s1 = inlined_call_operand.vmem [shape: f32[2,16], index: 1, kind: input, shape index: {}]   ;;  %s4661_s13 = inlined_call_operand.vmem [shape: bf16[64,64], index: 13, kind: input, shape index: {}]   ;;  %s4662_s14 = inlined_call_operand.vmem [shape: bf16[64,16], index: 14, kind: input, shape index: {}]   ;;  %s4663_s15 = inlined_call_operand.vmem [shape: bf16[16,64], index: 15, kind: input, shape index: {}]   ;;  %s4664_s16 = inlined_call_operand.vmem [shape: f32[2,16], index: 16, kind: input, shape index: {}]   ;;  %s4665_s17 = inlined_call_operand.vmem [shape: bf16[64,8], index: 17, kind: input, shape index: {}]   ;;  %s4666_s18 = inlined_call_operand.vmem [shape: bf16[256,64], index: 18, kind: input, shape index: {}]   ;;  %s4667_s19 = inlined_call_operand.vmem [shape: bf16[64,8], index: 19, kind: input, shape index: {}]   ;;  %s4668_s20 = inlined_call_operand.vmem [shape: bf16[8,64], index: 20, kind: input, shape index: {}]   ;;  %s4669_s21 = inlined_call_operand.vmem [shape: f32[2,8], index: 21, kind: input, shape index: {}]   ;;  %s4670_s22 = inlined_call_operand.vmem [shape: bf16[128,16], index: 22, kind: input, shape index: {}]   ;;  %s4671_s23 = inlined_call_operand.vmem [shape: bf16[256,48], index: 23, kind: input, shape index: {}]   ;;  %s4672_s24 = inlined_call_operand.vmem [shape: f32[32,48], index: 24, kind: output, shape index: {}]  }
   0x1   :  { %4681 = sst [smem:[#allocation2_spill]] %s4648_s0  ;;  %3381 = vmatprep.subr.bf16.mxu1 %v3917_v3  ;;  %3387 = vmatprep.mubr.msk.bf16.mxu1 %vm3918_vm1, %v3917_v3  ;;  %vm491_vm3 = vcmask 130048   ;;  %vm589_vm4 = vcmask 523264   ;;  %vm963_vm5 = vcmask 1040384   ;;  %vm1032_vm6 = vcmask 1043456  }
   0x2   :  { %4682 = sst [smem:[#allocation3_spill]] %s4649_s2  ;;  %s4690_s27 = sld [smem:[#allocation2_spill]]  ;;  %vm1028_vm7 = vcmask 64512   ;;  %vm1415_vm8 = vcmask 15360  }
   0x3   :  { %4683 = sst [smem:[#allocation4_spill]] %s4650_s3  ;;  %s4691_s25 = sld [smem:[#allocation3_spill]] }
   0x4   :  { %4684 = sst [smem:[#allocation5_spill]] %s4651_s4  ;;  %s4692_s28 = sld [smem:[#allocation4_spill]] }
   0x5   :  { %4685 = sst [smem:[#allocation6_spill]] %s4652_s5 }
   0x6   :  { %4686 = sst [smem:[#allocation7_spill]] %s4653_s6  ;;  %s4694_s29 = sld [smem:[#allocation6_spill]] }
   0x7   :  { %4687 = sst [smem:[#allocation8_spill]] %s4654_s7  ;;  %s4695_s26 = sld [smem:[#allocation7_spill]] }
   0x8   :  { %4688 = sst [smem:[#allocation9_spill]] %s4655_s8  ;;  %v78_v0 = vld [vmem:[%s4690_s27] sm:$0xff]  ;;  %v79_v1 = vld [vmem:[%s4690_s27 + $0x8] sm:$0xff]  ;;  %v80_v2 = vld [vmem:[%s4690_s27 + $0x10] sm:$0xff]  ;;  %s4696_s7 = sld [smem:[#allocation8_spill]] }
   0x9   :  { %4689 = sst [smem:[#allocation10_spill]] %s4656_s10  ;;  %v91_v4 = vpack.c.bf16 %v79_v1, %v78_v0  ;;  %v81_v5 = vld [vmem:[%s4690_s27 + $0x18] sm:$0xff]  ;;  %v3787_v7 = vld [vmem:[%s4691_s25] sm:$0xff]   ;;  %v3788_v8 = vld [vmem:[%s4691_s25 + $0x8] sm:$0xff]   ;;  %s4697_s8 = sld [smem:[#allocation9_spill]] }
   0xa   :  { %v92_v6 = vpack.c.bf16 %v81_v5, %v80_v2  ;;  %3363 = vmatprep.mubr.msk.bf16.mxu0 %vm113_vm0, %v3787_v7  ;;  %v3789_v9 = vld [vmem:[%s4691_s25 + $0x10] sm:$0xff]   ;;  %v3792_v10 = vld [vmem:[%s4692_s28] sm:$0xff]   ;;  %v3791_v11 = vld [vmem:[%s4692_s28 + $0x18] sm:$0xff]   ;;  %s4698_s2 = sld [smem:[#allocation10_spill]]  ;;  %s3919_s27 = smov 112  }
   0xb   :  { %3359 = vmatprep.subr.bf16.mxu0 %v91_v4  ;;  %3382 = vmatpush3.bf16.msra.mxu1 %v3792_v10  ;;  %v3794_v12 = vld [vmem:[%s4692_s28 + $0x8] sm:$0xff]   ;;  %v3793_v13 = vld [vmem:[%s4692_s28 + $0x20] sm:$0xff]   ;;  %v3790_v14 = vld [vmem:[%s4691_s25 + $0x18] sm:$0xff]   ;;  %s4693_s25 = sld [smem:[#allocation5_spill]] }
   0xc   :  { %3360 = vmatpush3.bf16.msra.mxu0 %v91_v4  ;;  %3383 = vmatprep.subr.bf16.mxu1 %v3917_v3  ;;  %v3795_v15 = vld [vmem:[%s4692_s28 + $0x28] sm:$0xff]   ;;  %v3796_v16 = vld [vmem:[%s4692_s28 + $0x10] sm:$0xff]   ;;  %v3798_v24 = vld [vmem:[%s4692_s28 + $0x38] sm:$0xff]  }
   0xd   :  { %3361 = vmatprep.subr.bf16.mxu0 %v92_v6  ;;  %v3797_v22 = vld [vmem:[%s4692_s28 + $0x30] sm:$0xff]   ;;  %v3799_v30 = vld [vmem:[%s4692_s28 + $0x40] sm:$0xff]   ;;  %v3800_v32 = vld [vmem:[%s4692_s28 + $0x48] sm:$0xff]  }
   0xe   :  { %v3801_v33 = vld [vmem:[%s4692_s28 + $0x50] sm:$0xff]   ;;  %v3802_v34 = vld [vmem:[%s4692_s28 + $0x58] sm:$0xff]   ;;  %v3805_v52 = vld [vmem:[%s4694_s29 + $0x20] sm:$0xff]  }
   0xf   :  { %3384 = vmatpush3.bf16.msra.mxu1 %v3794_v12  ;;  %v3806_v53 = vld [vmem:[%s4694_s29 + $0x28] sm:$0xff]   ;;  %v3807_v54 = vld [vmem:[%s4694_s29 + $0x30] sm:$0xff]   ;;  %v3808_v55 = vld [vmem:[%s4694_s29 + $0x38] sm:$0xff]  }
  0x10   :  { %3362 = vmatpush3.bf16.msra.mxu0 %v92_v6  ;;  %3385 = vmatprep.subr.bf16.mxu1 %v3917_v3  ;;  %v3821_v56 = vld [vmem:[%s4695_s26] sm:$0xff]   ;;  %v3822_v57 = vld [vmem:[%s4695_s26 + $0x8] sm:$0xff]   ;;  %v3823_v58 = vld [vmem:[%s4695_s26 + $0x10] sm:$0xff]  }
  0x11   :  { %3371 = vmatprep.subr.bf16.mxu0 %v3917_v3  ;;  %v3803_v35 = vld [vmem:[%s4693_s25] sm:$0xff]   ;;  %v3804_v51 = vld [vmem:[%s4693_s25 + $0x8] sm:$0xff]   ;;  %v3824_v59 = vld [vmem:[%s4695_s26 + $0x18] sm:$0xff]  }
  0x12   :  { %v3809_v0 = vld [vmem:[%s4694_s29] sm:$0xff]   ;;  %v3810_v2 = vld [vmem:[%s4694_s29 + $0x8] sm:$0xff]   ;;  %v3811_v4 = vld [vmem:[%s4694_s29 + $0x10] sm:$0xff]  }
  0x13   :  { %3364 = vmatmul.mubr.msk.bf16.vlgmr.msra.gmra.mrb[0].mxu0 %vm113_vm0, %v3788_v8  ;;  %3386 = vmatpush3.bf16.msra.mxu1 %v3796_v16  ;;  %v3812_v5 = vld [vmem:[%s4694_s29 + $0x18] sm:$0xff]   ;;  %v3813_v6 = vld [vmem:[%s4694_s29 + $0x40] sm:$0xff]   ;;  %v3814_v8 = vld [vmem:[%s4694_s29 + $0x48] sm:$0xff]  }
  0x14   :  { %3367 = vmatprep.mubr.msk.bf16.mxu0 %vm113_vm0, %v3789_v9  ;;  %3372 = vmatpush3.bf16.msra.mxu0 %v3791_v11  ;;  %v3815_v9 = vld [vmem:[%s4694_s29 + $0x50] sm:$0xff]   ;;  %v3816_v10 = vld [vmem:[%s4694_s29 + $0x58] sm:$0xff]   ;;  %v3817_v11 = vld [vmem:[%s4694_s29 + $0x60] sm:$0xff]  }
  0x15   :  { %3373 = vmatprep.subr.bf16.mxu0 %v3917_v3  ;;  %3391 = vmatprep.subr.bf16.mxu1 %v3917_v3 }
  0x18   :  { %3374 = vmatpush3.bf16.msra.mxu0 %v3793_v13  ;;  %v3818_v13 = vld [vmem:[%s4694_s29 + $0x68] sm:$0xff]  }
  0x19   :  { %3375 = vmatprep.subr.bf16.mxu0 %v3917_v3 }
  0x1b   :  { %3368 = vmatmul.mubr.msk.bf16.gmra.mrb[4].mxu0 %vm113_vm0, %v3790_v14  ;;  %v3819_v14 = vld [vmem:[%s4694_s29 + $0x70] sm:$0xff]  }
  0x1c   :  { %3376 = vmatpush3.bf16.msra.mxu0 %v3795_v15  ;;  %3377 = vmatprep.mubr.msk.bf16.mxu0 %vm3918_vm1, %v3917_v3  ;;  %v3820_v15 = vld [vmem:[%s4694_s29 + $0x78] sm:$0xff]  }
  0xe6   :  { %v3365_v17 = vpop.f32.mrb[0].mxu0 }
  0xe7   :  { %v160_v18 = vpop.f32.mrb[1].mxu0 }
  0xe8   :  { %v3366_v19 = vpop.f32.mrb[2].mxu0 }
  0xe9   :  { %v198_v20 = vpack.c.bf16 %v3366_v19, %v3365_v17  ;;  %v163_v21 = vpop.f32.mrb[3].mxu0 }
  0xea   :  { %v191_v23 = vpack.c.bf16 %v163_v21, %v160_v18 }
  0xeb   :  { %3378 = vmatmul.mubr.msk.bf16.vlgmr.msra.gmra.mrb[8].mxu0 %vm223_vm2, %v198_v20 }
  0xec   :  { %3388 = vmatmul.mubr.msk.bf16.vlgmr.msra.gmra.mrb[0].mxu1 %vm223_vm2, %v191_v23  ;;  %3413 = vmatprep.mubr.msk.bf16.mxu0 %vm491_vm3, %v3803_v35 }
  0xed   :  { %3392 = vmatpush3.bf16.msra.mxu1 %v3797_v22  ;;  %3397 = vmatprep.mubr.msk.bf16.mxu1 %vm3918_vm1, %v3917_v3  ;;  %v3825_v22 = vld [vmem:[%s4696_s7] sm:$0xff]  }
  0xee   :  { %v3369_v25 = vpop.f32.mrb[4].mxu0  ;;  %3393 = vmatprep.subr.bf16.mxu1 %v3917_v3 }
  0xef   :  { %v176_v26 = vpop.f32.mrb[5].mxu0 }
  0xf0   :  { %v3370_v27 = vpop.f32.mrb[6].mxu0 }
  0xf1   :  { %v401_v28 = vpack.c.bf16 %v3370_v27, %v3369_v25  ;;  %3394 = vmatpush3.bf16.msra.mxu1 %v3798_v24  ;;  %v179_v29 = vpop.f32.mrb[7].mxu0 }
  0xf2   :  { %v330_v31 = vpack.c.bf16 %v179_v29, %v176_v26  ;;  %3395 = vmatprep.subr.bf16.mxu1 %v3917_v3 }
  0xf5   :  { %3396 = vmatpush3.bf16.msra.mxu1 %v3799_v30 }
  0xf6   :  { %3401 = vmatprep.subr.bf16.mxu1 %v3917_v3 }
  0xf8   :  { %3398 = vmatmul.mubr.msk.bf16.vlgmr.msra.gmra.mrb[0].mxu1 %vm223_vm2, %v330_v31 }
  0xf9   :  { %3402 = vmatpush3.bf16.msra.mxu1 %v3800_v32  ;;  %3407 = vmatprep.mubr.msk.bf16.mxu1 %vm3918_vm1, %v3917_v3 }
  0xfa   :  { %3403 = vmatprep.subr.bf16.mxu1 %v3917_v3 }
  0xfd   :  { %3404 = vmatpush3.bf16.msra.mxu1 %v3801_v33 }
  0xfe   :  { %3405 = vmatprep.subr.bf16.mxu1 %v3917_v3 }
 0x101   :  { %3406 = vmatpush3.bf16.msra.mxu1 %v3802_v34 }
 0x102   :  { %3465 = vmatprep.subr.bf16.mxu1 %v3821_v56 }
 0x104   :  { %3408 = vmatmul.mubr.msk.bf16.vlgmr.msra.gmra.mrb[0].mxu1 %vm223_vm2, %v401_v28 }
 0x105   :  { %3466 = vmatpush3.bf16.msra.mxu1 %v3821_v56 }
 0x106   :  { %3467 = vmatprep.subr.bf16.mxu1 %v3822_v57 }
 0x109   :  { %3468 = vmatpush3.bf16.msra.mxu1 %v3822_v57 }
 0x10a   :  { %3469 = vmatprep.subr.bf16.mxu1 %v3823_v58 }
 0x10d   :  { %3470 = vmatpush3.bf16.msra.mxu1 %v3823_v58 }
 0x10e   :  { %3471 = vmatprep.subr.bf16.mxu1 %v3824_v59 }
 0x111   :  { %3472 = vmatpush3.bf16.msra.mxu1 %v3824_v59 }
 0x112   :  { %3476 = vmatprep.subr.bf16.mxu1 %v3917_v3 }
 0x1be   :  { %v261_v36 = vpop.f32.mrb[8].mxu0 }
 0x1bf   :  { %v3379_v37 = vpop.f32.mrb[9].mxu0 }
 0x1c0   :  { %v264_v38 = vpop.f32.mrb[10].mxu0 }
 0x1c1   :  { %v3380_v39 = vpop.f32.mrb[11].mxu0 }
 0x1d7   :  { %v463_v40 = vpop.f32.mrb[0].mxu1 }
 0x1d8   :  { %v3724_v41 = vadd.f32 %v463_v40, %v261_v36  ;;  %v3409_v42 = vpop.f32.mrb[1].mxu1 }
 0x1d9   :  { %v466_v43 = vpop.f32.mrb[2].mxu1 }
 0x1da   :  { %v472_v44 = vmul.f32 0.2, %v3724_v41  ;;  %v3725_v45 = vadd.f32 %v466_v43, %v264_v38  ;;  %v3410_v46 = vpop.f32.mrb[3].mxu1  ;;  %v955_v43 = vld [vmem:[%s4697_s8] sm:$0x1] }
 0x1db   :  { %v957_v46 = vld [vmem:[%s4697_s8 + $0x1] sm:$0x1] }
 0x1dc   :  { %v473_v47 = vmul.f32 0.2, %v3725_v45  ;;  %v474_v48 = vmax.f32 %v3724_v41, %v472_v44 }
 0x1de   :  { %v475_v49 = vmax.f32 %v3725_v45, %v473_v47 }
 0x1e0   :  { %v480_v50 = vpack.c.bf16 %v475_v49, %v474_v48 }
 0x1e2   :  { %3411 = vmatprep.subr.bf16.mxu0 %v480_v50 }
 0x1e3   :  { %3412 = vmatpush3.bf16.msra.mxu0 %v480_v50 }
 0x1e4   :  { %3417 = vmatprep.subr.bf16.mxu0 %v3917_v3 }
 0x1e6   :  { %3414 = vmatmul.mubr.msk.bf16.vlgmr.msra.gmra.mrb[12].mxu0 %vm491_vm3, %v3804_v51  ;;  %v3826_v51 = vld [vmem:[%s4698_s2 + $0x20] sm:$0xff]  }
 0x1e7   :  { %3418 = vmatpush3.bf16.msra.mxu0 %v3805_v52  ;;  %3425 = vmatprep.mubr.msk.bf16.mxu0 %vm3918_vm1, %v3917_v3  ;;  %v3828_v52 = vld [vmem:[%s4698_s2 + $0x28] sm:$0xff]  }
 0x1e8   :  { %3419 = vmatprep.subr.bf16.mxu0 %v3917_v3 }
 0x1eb   :  { %3420 = vmatpush3.bf16.msra.mxu0 %v3806_v53  ;;  %v3830_v53 = vld [vmem:[%s4698_s2 + $0x30] sm:$0xff]  }
 0x1ec   :  { %3421 = vmatprep.subr.bf16.mxu0 %v3917_v3 }
 0x1ef   :  { %3422 = vmatpush3.bf16.msra.mxu0 %v3807_v54  ;;  %v1014_v54 = vlaneseq }
 0x1f0   :  { %3423 = vmatprep.subr.bf16.mxu0 %v3917_v3 }
 0x1f3   :  { %3424 = vmatpush3.bf16.msra.mxu0 %v3808_v55  ;;  %v1015_v55 = vshrl.u32 %v1014_v54, 7 }
 0x1f4   :  { %3429 = vmatprep.subr.bf16.mxu0 %v3917_v3 }
 0x1f5   :  { %v4265_v56 = vsub.s32 0, %v1015_v55  ;;  %v4267_v57 = vsub.s32 1, %v1015_v55 }
 0x2b9   :  { %v3415_v60 = vpop.f32.mrb[12].mxu0 }
 0x2ba   :  { %v532_v61 = vpop.f32.mrb[13].mxu0  ;;  %v700_v12 = vpack.c.bf16 %v3415_v60, %v3415_v60 }
 0x2bb   :  { %v3416_v62 = vpop.f32.mrb[14].mxu0  ;;  %v547_v7 = vpack.c.bf16 %v532_v61, %v532_v61 }
 0x2bc   :  { %v535_v63 = vpop.f32.mrb[15].mxu0  ;;  %v777_v16 = vpack.c.bf16 %v3416_v62, %v3416_v62 }
 0x2bd   :  { %v556_v1 = vpack.c.bf16 %v535_v63, %v535_v63 }
 0x2bf   :  { %3426 = vmatmul.mubr.msk.bf16.vlgmr.msra.gmra.mrb[16].mxu0 %vm589_vm4, %v556_v1 }
 0x2c0   :  { %3430 = vmatpush3.bf16.msra.mxu0 %v3809_v0  ;;  %3437 = vmatprep.mubr.msk.bf16.mxu0 %vm3918_vm1, %v3917_v3 }
 0x2c1   :  { %3431 = vmatprep.subr.bf16.mxu0 %v3917_v3 }
 0x2c4   :  { %3432 = vmatpush3.bf16.msra.mxu0 %v3810_v2 }
 0x2c5   :  { %3433 = vmatprep.subr.bf16.mxu0 %v3917_v3 }
 0x2c8   :  { %3434 = vmatpush3.bf16.msra.mxu0 %v3811_v4 }
 0x2c9   :  { %3435 = vmatprep.subr.bf16.mxu0 %v3917_v3 }
 0x2cc   :  { %3436 = vmatpush3.bf16.msra.mxu0 %v3812_v5  ;;  %v1026_v5 = vld [vmem:[%s4657_s9] sm:$0xf] }
 0x2cd   :  { %3441 = vmatprep.subr.bf16.mxu0 %v3917_v3 }
 0x2cf   :  { %3438 = vmatmul.mubr.msk.bf16.vlgmr.msra.gmra.mrb[16].mxu0 %vm589_vm4, %v547_v7  ;;  %v3829_v7 = vld [vmem:[%s4698_s2 + $0x48] sm:$0xff]  }
 0x2d0   :  { %3442 = vmatpush3.bf16.msra.mxu0 %v3813_v6  ;;  %3449 = vmatprep.mubr.msk.bf16.mxu0 %vm3918_vm1, %v3917_v3  ;;  %v3827_v6 = vld [vmem:[%s4698_s2 + $0x40] sm:$0xff]  }
 0x2d1   :  { %3443 = vmatprep.subr.bf16.mxu0 %v3917_v3 }
 0x2d4   :  { %3444 = vmatpush3.bf16.msra.mxu0 %v3814_v8  ;;  %v3831_v8 = vld [vmem:[%s4698_s2 + $0x50] sm:$0xff]  }
 0x2d5   :  { %3445 = vmatprep.subr.bf16.mxu0 %v3917_v3 }
 0x2d8   :  { %3446 = vmatpush3.bf16.msra.mxu0 %v3815_v9  ;;  %v3832_v9 = vld [vmem:[%s4698_s2 + $0x38] sm:$0xff]  }
 0x2d9   :  { %3447 = vmatprep.subr.bf16.mxu0 %v3917_v3 }
 0x2dc   :  { %3448 = vmatpush3.bf16.msra.mxu0 %v3816_v10  ;;  %v3833_v10 = vld [vmem:[%s4698_s2 + $0x58] sm:$0xff]  }
 0x2dd   :  { %3453 = vmatprep.subr.bf16.mxu0 %v3917_v3 }
 0x2df   :  { %3450 = vmatmul.mubr.msk.bf16.vlgmr.msra.gmra.mrb[16].mxu0 %vm589_vm4, %v700_v12 }
 0x2e0   :  { %3454 = vmatpush3.bf16.msra.mxu0 %v3817_v11  ;;  %3461 = vmatprep.mubr.msk.bf16.mxu0 %vm3918_vm1, %v3917_v3 }
 0x2e1   :  { %3455 = vmatprep.subr.bf16.mxu0 %v3917_v3 }
 0x2e4   :  { %3456 = vmatpush3.bf16.msra.mxu0 %v3818_v13 }
 0x2e5   :  { %3457 = vmatprep.subr.bf16.mxu0 %v3917_v3 }
 0x2e8   :  { %3458 = vmatpush3.bf16.msra.mxu0 %v3819_v14 }
 0x2e9   :  { %3459 = vmatprep.subr.bf16.mxu0 %v3917_v3 }
 0x2ec   :  { %3460 = vmatpush3.bf16.msra.mxu0 %v3820_v15  ;;  %v3834_v15 = vld [vmem:[%s4698_s2] sm:$0xff]  }
 0x2ed   :  { %3487 = vmatprep.subr.bf16.mxu0 %v3917_v3 }
 0x2ef   :  { %3462 = vmatmul.mubr.msk.bf16.vlgmr.msra.gmra.mrb[16].mxu0 %vm589_vm4, %v777_v16 }
 0x2f0   :  { %3495 = vmatprep.mubr.msk.bf16.mxu0 %vm3918_vm1, %v3917_v3  ;;  %3488 = vmatpush3.bf16.msra.mxu0 %v3826_v51 }
 0x2f1   :  { %3489 = vmatprep.subr.bf16.mxu0 %v3917_v3 }
 0x2f4   :  { %3490 = vmatpush3.bf16.msra.mxu0 %v3828_v52  ;;  %v82_v52 = vld [vmem:[%s4660_s1] sm:$0x3] }
 0x2f5   :  { %3491 = vmatprep.subr.bf16.mxu0 %v3917_v3 }
 0x2f8   :  { %3492 = vmatpush3.bf16.msra.mxu0 %v3830_v53 }
 0x2f9   :  { %3493 = vmatprep.subr.bf16.mxu0 %v3917_v3 }
 0x2fc   :  { %3494 = vmatpush3.bf16.msra.mxu0 %v3832_v9  ;;  %v3846_v9 = vld [vmem:[%s4661_s13 + $0x10] sm:$0xff]  }
 0x2fd   :  { %3499 = vmatprep.subr.bf16.mxu0 %v3917_v3 }
 0x3c2   :  { %v847_v17 = vpop.f32.mrb[16].mxu0 }
 0x3c3   :  { %v854_v18 = vmul.f32 %v847_v17, %v847_v17  ;;  %v3463_v19 = vpop.f32.mrb[17].mxu0  ;;  %3473 = vmatprep.mubr.msk.f32.mxu1 %vm589_vm4, %v847_v17 }
 0x3c4   :  { %v850_v20 = vpop.f32.mrb[18].mxu0  ;;  %v3835_v19 = vld [vmem:[%s4698_s2 + $0x8] sm:$0xff]  }
 0x3c5   :  { %v3464_v21 = vpop.f32.mrb[19].mxu0  ;;  %3474 = vmatmul.mubr.msk.f32.vlgmr.msra.gmra.mrb[4].mxu1 %vm589_vm4, %v854_v18  ;;  %v3836_v20 = vld [vmem:[%s4698_s2 + $0x10] sm:$0xff]  }
 0x3c6   :  { %3478 = vmatprep.mubr.msk.f32.mxu1 %vm3918_vm1, %v3917_v3  ;;  %3477 = vmatpush3.bf16.msra.mxu1 %v3825_v22  ;;  %v3837_v21 = vld [vmem:[%s4698_s2 + $0x18] sm:$0xff]   ;;  %v3838_v22 = vld [vmem:[%s4698_s2 + $0x60] sm:$0xff]  }
 0x3c7   :  { %3481 = vmatprep.subr.bf16.mxu1 %v3917_v3 }
 0x498   :  { %v3475_v23 = vpop.f32.mrb[4].mxu1 }
 0x499   :  { %v943_v24 = vsel %vm491_vm3, %v3475_v23, 0.0  ;;  %v927_v25 = vpop.f32.mrb[5].mxu1  ;;  %v3839_v23 = vld [vmem:[%s4698_s2 + $0x68] sm:$0xff]  }
 0x49a   :  { %v944_v26 = vrot.slane %v943_v24, 4  ;;  %v936_v27 = vsel %vm491_vm3, %v927_v25, 0.0  ;;  %v3841_v25 = vld [vmem:[%s4698_s2 + $0x78] sm:$0xff]  }
 0x49b   :  { %v937_v28 = vrot.slane %v936_v27, 4 }
 0x49c   :  { %v945_v29 = vadd.f32 %v944_v26, %v943_v24  ;;  %v3840_v24 = vld [vmem:[%s4698_s2 + $0x70] sm:$0xff]  }
 0x49d   :  { %v938_v30 = vadd.f32 %v937_v28, %v936_v27 }
 0x49e   :  { %v946_v31 = vrot.slane %v945_v29, 2 }
 0x49f   :  { %v939_v32 = vrot.slane %v938_v30, 2 }
 0x4a0   :  { %v947_v33 = vadd.f32 %v946_v31, %v945_v29 }
 0x4a1   :  { %v940_v34 = vadd.f32 %v939_v32, %v938_v30 }
 0x4a2   :  { %v948_v35 = vrot.slane %v947_v33, 1 }
 0x4a3   :  { %v941_v36 = vrot.slane %v940_v34, 1 }
 0x4a4   :  { %v949_v38 = vadd.f32 %v948_v35, %v947_v33 }
 0x4a5   :  { %v942_v37 = vadd.f32 %v941_v36, %v940_v34 }
 0x4a7   :  { %v950_v39 = vmul.f32 %v942_v37, %v942_v37 }
 0x4a9   :  { %v951_v40 = vsub.f32 %v949_v38, %v950_v39 }
 0x4ab   :  { %v952_v41 = vmax.f32 %v951_v40, 0.0 }
 0x4ad   :  { %v953_v42 = vadd.f32 1e-05, %v952_v41 }
 0x4af   :  { %3901 = vrsqrt.f32 %v953_v42  ;;  %v3099_v42 = vld [vmem:[%s4658_s11] ss:$0 sm:$0xff] }
 0x4b9   :  { %v3902_v44 = vpop.eup %3901 }
 0x4ba   :  { %v956_v45 = vmul.f32 %v3902_v44, %v955_v43 }
 0x4bc   :  { %v958_v47 = vmul.f32 %v956_v45, %v942_v37 }
 0x4be   :  { %v959_v48 = vsub.f32 %v957_v46, %v958_v47 }
 0x4c0   :  { %v961_v49 = vrot.slane %v959_v48, 7 }
 0x4c2   :  { %v964_v50 = vsel %vm963_vm5, %v956_v45, %v961_v49 }
 0x4c3   :  { %3479 = vmatmul.mubr.msk.f32.vlgmr.msra.gmra.mrb[6].mxu1 %vm491_vm3, %v964_v50  ;;  %v3842_v50 = vld [vmem:[%s4659_s12] sm:$0xff]  }
 0x4c4   :  { %3483 = vmatprep.mubr.msk.bf16.mxu1 %vm3918_vm1, %v3917_v3 }
 0x596   :  { %v1010_v58 = vpop.f32.mrb[6].mxu1 }
 0x597   :  { %v1017_v59 = vrot.slane %v1010_v58, %v4265_v56  ;;  %v3480_v60 = vpop.f32.mrb[7].mxu1  ;;  %v1022_v62 = vrot.slane %v1010_v58, %v4267_v57 }
 0x598   :  { %v3843_v60 = vld [vmem:[%s4659_s12 + $0x8] sm:$0xff]  }
 0x599   :  { %v1018_v61 = vmul.f32 %v1017_v59, %v847_v17 }
 0x59b   :  { %v1023_v63 = vadd.f32 %v1022_v62, %v1018_v61  ;;  %v3844_v61 = vld [vmem:[%s4661_s13 + $0x8] sm:$0xff]   ;;  %v3848_v62 = vld [vmem:[%s4662_s14] sm:$0xff]  }
 0x59d   :  { %v1024_v0 = vmul.f32 0.2, %v1023_v63 }
 0x59f   :  { %v1025_v1 = vmax.f32 %v1023_v63, %v1024_v0  ;;  %v3849_v63 = vld [vmem:[%s4662_s14 + $0x8] sm:$0xff]   ;;  %v3850_v0 = vld [vmem:[%s4662_s14 + $0x10] sm:$0xff]  }
 0x5a1   :  { %v1027_v2 = vpack.c.bf16 %v1025_v1, %v1025_v1  ;;  %v3851_v1 = vld [vmem:[%s4662_s14 + $0x18] sm:$0xff]  }
 0x5a3   :  { %v1034_v4 = vsel %vm1032_vm6, %v1027_v2, 0 }
 0x5a4   :  { %3482 = vmatpush3.bf16.msra.mxu1 %v1034_v4 }
 0x5a5   :  { %3511 = vmatprep.subr.bf16.mxu1 %v3917_v3 }
 0x5a7   :  { %3484 = vmatmul.mubr.msk.bf16.vlgmr.msra.gmra.mrb[8].mxu1 %vm1028_vm7, %v1026_v5 }
 0x5a8   :  { %3512 = vmatpush3.bf16.msra.mxu1 %v3827_v6  ;;  %3519 = vmatprep.mubr.msk.bf16.mxu1 %vm3918_vm1, %v3917_v3 }
 0x5a9   :  { %3513 = vmatprep.subr.bf16.mxu1 %v3917_v3 }
 0x5ac   :  { %3514 = vmatpush3.bf16.msra.mxu1 %v3829_v7  ;;  %v3845_v7 = vld [vmem:[%s4661_s13] sm:$0xff]  }
 0x5ad   :  { %3515 = vmatprep.subr.bf16.mxu1 %v3917_v3 }
 0x5b0   :  { %3516 = vmatpush3.bf16.msra.mxu1 %v3831_v8 }
 0x5b1   :  { %3517 = vmatprep.subr.bf16.mxu1 %v3917_v3 }
 0x5b4   :  { %3518 = vmatpush3.bf16.msra.mxu1 %v3833_v10 }
 0x67a   :  { %v1070_v11 = vpop.f32.mrb[8].mxu1 }
 0x67b   :  { %v1076_v12 = vpack.c.bf16 %v1070_v11, %v1070_v11  ;;  %v3485_v13 = vpop.f32.mrb[9].mxu1  ;;  %v3847_v11 = vld [vmem:[%s4661_s13 + $0x18] sm:$0xff]  }
 0x67c   :  { %v1073_v14 = vpop.f32.mrb[10].mxu1 }
 0x67d   :  { %v1094_v16 = vrot.slane %v1076_v12, 1  ;;  %v1237_v17 = vrot.slane %v1076_v12, 2  ;;  %v3486_v18 = vpop.f32.mrb[11].mxu1  ;;  %v1314_v26 = vrot.slane %v1076_v12, 3 }
 0x67f   :  { %3496 = vmatmul.mubr.msk.bf16.vlgmr.msra.gmra.mrb[20].mxu0 %vm589_vm4, %v1094_v16  ;;  %3520 = vmatmul.mubr.msk.bf16.vlgmr.msra.gmra.mrb[12].mxu1 %vm589_vm4, %v1237_v17 }
 0x680   :  { %3500 = vmatpush3.bf16.msra.mxu0 %v3834_v15  ;;  %3507 = vmatprep.mubr.msk.bf16.mxu0 %vm3918_vm1, %v3917_v3 }
 0x681   :  { %3501 = vmatprep.subr.bf16.mxu0 %v3917_v3  ;;  %3537 = vmatprep.mubr.msk.bf16.mxu1 %vm1415_vm8, %v3842_v50 }
 0x684   :  { %3502 = vmatpush3.bf16.msra.mxu0 %v3835_v19  ;;  %v3852_v19 = vld [vmem:[%s4663_s15] sm:$0xff]  }
 0x685   :  { %3503 = vmatprep.subr.bf16.mxu0 %v3917_v3 }
 0x688   :  { %3504 = vmatpush3.bf16.msra.mxu0 %v3836_v20 }
 0x689   :  { %3505 = vmatprep.subr.bf16.mxu0 %v3917_v3 }
 0x68c   :  { %3506 = vmatpush3.bf16.msra.mxu0 %v3837_v21 }
 0x68d   :  { %3523 = vmatprep.subr.bf16.mxu0 %v3917_v3 }
 0x68f   :  { %3508 = vmatmul.mubr.msk.bf16.vlgmr.msra.gmra.mrb[24].mxu0 %vm589_vm4, %v1076_v12 }
 0x690   :  { %3524 = vmatpush3.bf16.msra.mxu0 %v3838_v22  ;;  %3531 = vmatprep.mubr.msk.bf16.mxu0 %vm3918_vm1, %v3917_v3 }
 0x691   :  { %3525 = vmatprep.subr.bf16.mxu0 %v3917_v3 }
 0x694   :  { %3526 = vmatpush3.bf16.msra.mxu0 %v3839_v23 }
 0x695   :  { %3527 = vmatprep.subr.bf16.mxu0 %v3917_v3 }
 0x698   :  { %3528 = vmatpush3.bf16.msra.mxu0 %v3840_v24 }
 0x699   :  { %3529 = vmatprep.subr.bf16.mxu0 %v3917_v3 }
 0x69c   :  { %3530 = vmatpush3.bf16.msra.mxu0 %v3841_v25 }
 0x69d   :  { %3565 = vmatprep.subr.bf16.mxu0 %v3848_v62 }
 0x69f   :  { %3532 = vmatmul.mubr.msk.bf16.vlgmr.msra.gmra.mrb[28].mxu0 %vm589_vm4, %v1314_v26 }
 0x6a0   :  { %3566 = vmatpush3.bf16.msra.mxu0 %v3848_v62  ;;  %v3855_v62 = vld [vmem:[%s4665_s17 + $0x10] sm:$0xff]  }
 0x6a1   :  { %3567 = vmatprep.subr.bf16.mxu0 %v3849_v63 }
 0x6a4   :  { %3568 = vmatpush3.bf16.msra.mxu0 %v3849_v63  ;;  %v3857_v63 = vld [vmem:[%s4666_s18 + $0x20] sm:$0xff]  }
 0x6a5   :  { %3569 = vmatprep.subr.bf16.mxu0 %v3850_v0 }
 0x6a8   :  { %3570 = vmatpush3.bf16.msra.mxu0 %v3850_v0  ;;  %v3858_v0 = vld [vmem:[%s4666_s18 + $0x28] sm:$0xff]  }
 0x6a9   :  { %3571 = vmatprep.subr.bf16.mxu0 %v3851_v1 }
 0x6ac   :  { %3572 = vmatpush3.bf16.msra.mxu0 %v3851_v1  ;;  %v3856_v1 = vld [vmem:[%s4665_s17 + $0x18] sm:$0xff]  }
 0x6ad   :  { %3576 = vmatprep.subr.bf16.mxu0 %v3917_v3 }
 0x752   :  { %v1156_v27 = vpop.f32.mrb[20].mxu0  ;;  %v1299_v28 = vpop.f32.mrb[12].mxu1 }
 0x753   :  { %v3497_v29 = vpop.f32.mrb[21].mxu0  ;;  %v3521_v30 = vpop.f32.mrb[13].mxu1 }
 0x754   :  { %v1159_v31 = vpop.f32.mrb[22].mxu0  ;;  %v1302_v32 = vpop.f32.mrb[14].mxu1 }
 0x755   :  { %v3498_v33 = vpop.f32.mrb[23].mxu0  ;;  %v3522_v34 = vpop.f32.mrb[15].mxu1 }
 0x762   :  { %v1223_v35 = vpop.f32.mrb[24].mxu0 }
 0x763   :  { %v1224_v36 = vadd.f32 %v1223_v35, %v1156_v27  ;;  %v3509_v37 = vpop.f32.mrb[25].mxu0 }
 0x764   :  { %v1226_v38 = vpop.f32.mrb[26].mxu0 }
 0x765   :  { %v3510_v39 = vpop.f32.mrb[27].mxu0  ;;  %v1305_v40 = vadd.f32 %v1299_v28, %v1224_v36 }
 0x772   :  { %v1376_v41 = vpop.f32.mrb[28].mxu0 }
 0x773   :  { %v1382_v43 = vadd.f32 %v1376_v41, %v1305_v40  ;;  %v3533_v44 = vpop.f32.mrb[29].mxu0  ;;  %v1785_v40 = vld [vmem:[%s4664_s16] sm:$0x1] }
 0x774   :  { %v1379_v45 = vpop.f32.mrb[30].mxu0 }
 0x775   :  { %v1390_v46 = vadd.f32 %v3099_v42, %v1382_v43  ;;  %v3534_v47 = vpop.f32.mrb[31].mxu0  ;;  %v1787_v43 = vld [vmem:[%s4664_s16 + $0x1] sm:$0x1] }
 0x777   :  { %v1391_v48 = vmul.f32 0.5, %v1390_v46 }
 0x779   :  { %v1392_v49 = vmul.f32 1.442695, %v1391_v48  ;;  %v3853_v48 = vld [vmem:[%s4665_s17] sm:$0xff]  }
 0x77b   :  { %3903 = vpow2.f32 %v1392_v49 }
 0x785   :  { %v3904_v51 = vpop.eup %3903 }
 0x786   :  { %1395 = vrot.lane.b32.xlu0 %v3904_v51, %s3919_s27 }
 0x7f8   :  { %v1396_v53 = vpop.permute.xlu0 %1395 }
 0x7f9   :  { %v1398_v54 = vmul.f32 %v1396_v53, %v82_v52 }
 0x7fb   :  { %v1399_v55 = vadd.f32 %v1398_v54, %v1390_v46 }
 0x7fd   :  { %v1404_v58 = vpack.c.bf16 %v1399_v55, %v1399_v55 }
 0x7ff   :  { %3782 = vmatprep.subr.msk.bf16.mxu1 %vm963_vm5, %v1404_v58  ;;  %v1423_v59 = vsel %vm963_vm5, %v1404_v58, 0 }
 0x800   :  { %3536 = vmatpush3.bf16.msra.mxu1 %v1423_v59 }
 0x801   :  { %3541 = vmatprep.subr.bf16.mxu1 %v3917_v3 }
 0x803   :  { %3538 = vmatmul.mubr.msk.bf16.vlgmr.msra.gmra.mrb[16].mxu1 %vm1415_vm8, %v3843_v60 }
 0x804   :  { %3543 = vmatprep.mubr.msk.bf16.mxu1 %vm3918_vm1, %v3917_v3  ;;  %3542 = vmatpush3.bf16.msra.mxu1 %v3844_v61  ;;  %v3854_v61 = vld [vmem:[%s4665_s17 + $0x8] sm:$0xff]  }
 0x805   :  { %3547 = vmatprep.subr.bf16.mxu1 %v3917_v3 }
 0x8d6   :  { %v3539_v2 = vpop.f32.mrb[16].mxu1 }
 0x8d7   :  { %v1459_v4 = vpop.f32.mrb[17].mxu1  ;;  %v1578_v12 = vpack.c.bf16 %v3539_v2, %v3539_v2  ;;  %v3859_v2 = vld [vmem:[%s4666_s18 + $0x30] sm:$0xff]  }
 0x8d8   :  { %v3540_v5 = vpop.f32.mrb[18].mxu1  ;;  %v1474_v10 = vpack.c.bf16 %v1459_v4, %v1459_v4  ;;  %v3860_v4 = vld [vmem:[%s4666_s18 + $0x38] sm:$0xff]  }
 0x8d9   :  { %v1462_v6 = vpop.f32.mrb[19].mxu1  ;;  %v1631_v13 = vpack.c.bf16 %v3540_v5, %v3540_v5  ;;  %v3873_v5 = vld [vmem:[%s4667_s19] sm:$0xff]  }
 0x8da   :  { %v1477_v8 = vpack.c.bf16 %v1462_v6, %v1462_v6  ;;  %v3874_v6 = vld [vmem:[%s4667_s19 + $0x8] sm:$0xff]  }
 0x8dc   :  { %3544 = vmatmul.mubr.msk.bf16.vlgmr.msra.gmra.mrb[20].mxu1 %vm491_vm3, %v1477_v8  ;;  %v3876_v8 = vld [vmem:[%s4667_s19 + $0x18] sm:$0xff]  }
 0x8dd   :  { %3548 = vmatpush3.bf16.msra.mxu1 %v3845_v7  ;;  %3549 = vmatprep.mubr.msk.bf16.mxu1 %vm3918_vm1, %v3917_v3  ;;  %v3875_v7 = vld [vmem:[%s4667_s19 + $0x10] sm:$0xff]  }
 0x8de   :  { %3553 = vmatprep.subr.bf16.mxu1 %v3917_v3 }
 0x8e8   :  { %3550 = vmatmul.mubr.msk.bf16.vlgmr.msra.gmra.mrb[20].mxu1 %vm491_vm3, %v1474_v10 }
 0x8e9   :  { %3554 = vmatpush3.bf16.msra.mxu1 %v3846_v9  ;;  %3555 = vmatprep.mubr.msk.bf16.mxu1 %vm3918_vm1, %v3917_v3 }
 0x8ea   :  { %3559 = vmatprep.subr.bf16.mxu1 %v3917_v3 }
 0x8f4   :  { %3556 = vmatmul.mubr.msk.bf16.vlgmr.msra.gmra.mrb[20].mxu1 %vm491_vm3, %v1578_v12  ;;  %v3861_v12 = vld [vmem:[%s4666_s18] sm:$0xff]  }
 0x8f5   :  { %3560 = vmatpush3.bf16.msra.mxu1 %v3847_v11  ;;  %3561 = vmatprep.mubr.msk.bf16.mxu1 %vm3918_vm1, %v3917_v3 }
 0x8f6   :  { %3639 = vmatprep.subr.bf16.mxu1 %v3873_v5 }
 0x900   :  { %3562 = vmatmul.mubr.msk.bf16.vlgmr.msra.gmra.mrb[20].mxu1 %vm491_vm3, %v1631_v13 }
 0x901   :  { %3640 = vmatpush3.bf16.msra.mxu1 %v3873_v5  ;;  %v2398_v5 = vld [vmem:[%s4669_s21] sm:$0x1] }
 0x902   :  { %3641 = vmatprep.subr.bf16.mxu1 %v3874_v6 }
 0x905   :  { %3642 = vmatpush3.bf16.msra.mxu1 %v3874_v6 }
 0x906   :  { %3643 = vmatprep.subr.bf16.mxu1 %v3875_v7 }
 0x909   :  { %3644 = vmatpush3.bf16.msra.mxu1 %v3875_v7 }
 0x90a   :  { %3645 = vmatprep.subr.bf16.mxu1 %v3876_v8 }
 0x90d   :  { %3646 = vmatpush3.bf16.msra.mxu1 %v3876_v8  ;;  %v2400_v8 = vld [vmem:[%s4669_s21 + $0x1] sm:$0x1] }
 0x90e   :  { %3653 = vmatprep.subr.bf16.mxu1 %v3917_v3 }
 0x9d3   :  { %v1677_v14 = vpop.f32.mrb[20].mxu1 }
 0x9d4   :  { %v1684_v15 = vmul.f32 %v1677_v14, %v1677_v14  ;;  %v3563_v16 = vpop.f32.mrb[21].mxu1  ;;  %3573 = vmatprep.mubr.msk.f32.mxu0 %vm589_vm4, %v1677_v14 }
 0x9d5   :  { %v1680_v17 = vpop.f32.mrb[22].mxu1  ;;  %v3862_v16 = vld [vmem:[%s4666_s18 + $0x8] sm:$0xff]  }
 0x9d6   :  { %v3564_v18 = vpop.f32.mrb[23].mxu1  ;;  %3574 = vmatmul.mubr.msk.f32.vlgmr.msra.gmra.mrb[32].mxu0 %vm589_vm4, %v1684_v15 }
 0x9d7   :  { %3578 = vmatprep.mubr.msk.f32.mxu0 %vm3918_vm1, %v3917_v3  ;;  %3577 = vmatpush3.bf16.msra.mxu0 %v3852_v19  ;;  %v3863_v19 = vld [vmem:[%s4666_s18 + $0x10] sm:$0xff]  }
 0xaa9   :  { %v3575_v20 = vpop.f32.mrb[32].mxu0 }
 0xaaa   :  { %v1773_v21 = vsel %vm491_vm3, %v3575_v20, 0.0  ;;  %v1757_v22 = vpop.f32.mrb[33].mxu0 }
 0xaab   :  { %v1774_v23 = vrot.slane %v1773_v21, 4  ;;  %v1766_v24 = vsel %vm491_vm3, %v1757_v22, 0.0 }
 0xaac   :  { %v1767_v25 = vrot.slane %v1766_v24, 4 }
 0xaad   :  { %v1775_v26 = vadd.f32 %v1774_v23, %v1773_v21 }
 0xaae   :  { %v1768_v27 = vadd.f32 %v1767_v25, %v1766_v24  ;;  %v3864_v24 = vld [vmem:[%s4666_s18 + $0x18] sm:$0xff]   ;;  %v3865_v25 = vld [vmem:[%s4666_s18 + $0x40] sm:$0xff]  }
 0xaaf   :  { %v1776_v28 = vrot.slane %v1775_v26, 2 }
 0xab0   :  { %v1769_v29 = vrot.slane %v1768_v27, 2 }
 0xab1   :  { %v1777_v30 = vadd.f32 %v1776_v28, %v1775_v26  ;;  %v3866_v26 = vld [vmem:[%s4666_s18 + $0x48] sm:$0xff]   ;;  %v3868_v28 = vld [vmem:[%s4666_s18 + $0x58] sm:$0xff]  }
 0xab2   :  { %v1770_v31 = vadd.f32 %v1769_v29, %v1768_v27  ;;  %v3867_v27 = vld [vmem:[%s4666_s18 + $0x50] sm:$0xff]   ;;  %v3869_v29 = vld [vmem:[%s4666_s18 + $0x60] sm:$0xff]  }
 0xab3   :  { %v1778_v32 = vrot.slane %v1777_v30, 1 }
 0xab4   :  { %v1771_v33 = vrot.slane %v1770_v31, 1 }
 0xab5   :  { %v1779_v35 = vadd.f32 %v1778_v32, %v1777_v30  ;;  %v3870_v30 = vld [vmem:[%s4666_s18 + $0x68] sm:$0xff]   ;;  %v3872_v32 = vld [vmem:[%s4666_s18 + $0x78] sm:$0xff]  }
 0xab6   :  { %v1772_v34 = vadd.f32 %v1771_v33, %v1770_v31  ;;  %v3871_v31 = vld [vmem:[%s4666_s18 + $0x70] sm:$0xff]  }
 0xab8   :  { %v1780_v36 = vmul.f32 %v1772_v34, %v1772_v34 }
 0xaba   :  { %v1781_v37 = vsub.f32 %v1779_v35, %v1780_v36 }
 0xabc   :  { %v1782_v38 = vmax.f32 %v1781_v37, 0.0 }
 0xabe   :  { %v1783_v39 = vadd.f32 1e-05, %v1782_v38 }
 0xac0   :  { %3905 = vrsqrt.f32 %v1783_v39  ;;  %v2407_v39 = vld [vmem:[%s4668_s20] sm:$0xf] }
 0xaca   :  { %v3906_v41 = vpop.eup %3905 }
 0xacb   :  { %v1786_v42 = vmul.f32 %v3906_v41, %v1785_v40  ;;  %v2412_v40 = vsel %vm1032_vm6, %v2407_v39, 0 }
 0xacd   :  { %v1788_v44 = vmul.f32 %v1786_v42, %v1772_v34 }
 0xacf   :  { %v1789_v45 = vsub.f32 %v1787_v43, %v1788_v44 }
 0xad1   :  { %v1791_v46 = vrot.slane %v1789_v45, 7 }
 0xad3   :  { %v1793_v47 = vsel %vm963_vm5, %v1786_v42, %v1791_v46 }
 0xad4   :  { %3579 = vmatmul.mubr.msk.f32.vlgmr.msra.gmra.mrb[34].mxu0 %vm491_vm3, %v1793_v47 }
 0xad5   :  { %3583 = vmatprep.mubr.msk.bf16.mxu0 %vm1028_vm7, %v3853_v48 }
 0xba7   :  { %v1839_v49 = vpop.f32.mrb[34].mxu0 }
 0xba8   :  { %v1846_v50 = vrot.slane %v1839_v49, %v4265_v56  ;;  %v3580_v51 = vpop.f32.mrb[35].mxu0  ;;  %v1851_v53 = vrot.slane %v1839_v49, %v4267_v57 }
 0xbaa   :  { %v1847_v52 = vmul.f32 %v1846_v50, %v1677_v14 }
 0xbac   :  { %v1852_v54 = vadd.f32 %v1851_v53, %v1847_v52 }
 0xbae   :  { %v1853_v55 = vmul.f32 0.2, %v1852_v54 }
 0xbb0   :  { %v1854_v58 = vmax.f32 %v1852_v54, %v1853_v55 }
 0xbb2   :  { %v1863_v59 = vpack.c.bf16 %v1854_v58, %v1854_v58 }
 0xbb4   :  { %3783 = vmatprep.subr.msk.bf16.mxu0 %vm1032_vm6, %v1863_v59  ;;  %v1897_v60 = vsel %vm1032_vm6, %v1863_v59, 0 }
 0xbb5   :  { %3582 = vmatpush3.bf16.msra.mxu0 %v1897_v60 }
 0xbb6   :  { %3591 = vmatprep.subr.bf16.mxu0 %v3917_v3 }
 0xbb8   :  { %3584 = vmatmul.mubr.msk.bf16.vlgmr.msra.gmra.mrb[36].mxu0 %vm1028_vm7, %v3854_v61 }
 0xbb9   :  { %3587 = vmatprep.mubr.msk.bf16.mxu0 %vm1028_vm7, %v3855_v62  ;;  %3592 = vmatpush3.bf16.msra.mxu0 %v3857_v63 }
 0xbba   :  { %3593 = vmatprep.subr.bf16.mxu0 %v3917_v3 }
 0xbbd   :  { %3594 = vmatpush3.bf16.msra.mxu0 %v3858_v0 }
 0xbbe   :  { %3595 = vmatprep.subr.bf16.mxu0 %v3917_v3 }
 0xbc0   :  { %3588 = vmatmul.mubr.msk.bf16.gmra.mrb[40].mxu0 %vm1028_vm7, %v3856_v1 }
 0xbc1   :  { %3596 = vmatpush3.bf16.msra.mxu0 %v3859_v2  ;;  %3599 = vmatprep.mubr.msk.bf16.mxu0 %vm3918_vm1, %v3917_v3 }
 0xbc2   :  { %3597 = vmatprep.subr.bf16.mxu0 %v3917_v3 }
 0xbc5   :  { %3598 = vmatpush3.bf16.msra.mxu0 %v3860_v4 }
 0xbc6   :  { %3603 = vmatprep.subr.bf16.mxu0 %v3917_v3 }
 0xc8b   :  { %v3585_v9 = vpop.f32.mrb[36].mxu0 }
 0xc8c   :  { %v1933_v10 = vpop.f32.mrb[37].mxu0 }
 0xc8d   :  { %v3586_v11 = vpop.f32.mrb[38].mxu0 }
 0xc8e   :  { %v1973_v13 = vpack.c.bf16 %v3586_v11, %v3585_v9  ;;  %v1936_v14 = vpop.f32.mrb[39].mxu0 }
 0xc8f   :  { %v1964_v15 = vpack.c.bf16 %v1936_v14, %v1933_v10 }
 0xc90   :  { %3600 = vmatmul.mubr.msk.bf16.vlgmr.msra.gmra.mrb[44].mxu0 %vm589_vm4, %v1973_v13  ;;  %v3877_v13 = vld [vmem:[%s4670_s22] sm:$0xff]  }
 0xc91   :  { %3604 = vmatpush3.bf16.msra.mxu0 %v3861_v12  ;;  %3611 = vmatprep.mubr.msk.bf16.mxu0 %vm3918_vm1, %v3917_v3 }
 0xc92   :  { %3605 = vmatprep.subr.bf16.mxu0 %v3917_v3 }
 0xc93   :  { %v3589_v17 = vpop.f32.mrb[40].mxu0 }
 0xc94   :  { %v1949_v18 = vpop.f32.mrb[41].mxu0 }
 0xc95   :  { %3606 = vmatpush3.bf16.msra.mxu0 %v3862_v16  ;;  %v3590_v20 = vpop.f32.mrb[42].mxu0 }
 0xc96   :  { %3607 = vmatprep.subr.bf16.mxu0 %v3917_v3  ;;  %v2197_v21 = vpack.c.bf16 %v3590_v20, %v3589_v17  ;;  %v1952_v22 = vpop.f32.mrb[43].mxu0 }
 0xc97   :  { %v2118_v23 = vpack.c.bf16 %v1952_v22, %v1949_v18 }
 0xc99   :  { %3608 = vmatpush3.bf16.msra.mxu0 %v3863_v19 }
 0xc9a   :  { %3609 = vmatprep.subr.bf16.mxu0 %v3917_v3 }
 0xc9d   :  { %3610 = vmatpush3.bf16.msra.mxu0 %v3864_v24 }
 0xc9e   :  { %3615 = vmatprep.subr.bf16.mxu0 %v3917_v3 }
 0xca0   :  { %3612 = vmatmul.mubr.msk.bf16.vlgmr.msra.gmra.mrb[44].mxu0 %vm589_vm4, %v1964_v15 }
 0xca1   :  { %3616 = vmatpush3.bf16.msra.mxu0 %v3865_v25  ;;  %3623 = vmatprep.mubr.msk.bf16.mxu0 %vm3918_vm1, %v3917_v3 }
 0xca2   :  { %3617 = vmatprep.subr.bf16.mxu0 %v3917_v3 }
 0xca5   :  { %3618 = vmatpush3.bf16.msra.mxu0 %v3866_v26 }
 0xca6   :  { %3619 = vmatprep.subr.bf16.mxu0 %v3917_v3 }
 0xca9   :  { %3620 = vmatpush3.bf16.msra.mxu0 %v3867_v27  ;;  %v3885_v27 = vld [vmem:[%s4671_s23 + $0x20] sm:$0xff]  }
 0xcaa   :  { %3621 = vmatprep.subr.bf16.mxu0 %v3917_v3 }
 0xcad   :  { %3622 = vmatpush3.bf16.msra.mxu0 %v3868_v28  ;;  %v3886_v28 = vld [vmem:[%s4671_s23 + $0x28] sm:$0xff]  }
 0xcae   :  { %3627 = vmatprep.subr.bf16.mxu0 %v3917_v3 }
 0xcb0   :  { %3624 = vmatmul.mubr.msk.bf16.vlgmr.msra.gmra.mrb[44].mxu0 %vm589_vm4, %v2118_v23 }
 0xcb1   :  { %3628 = vmatpush3.bf16.msra.mxu0 %v3869_v29  ;;  %3635 = vmatprep.mubr.msk.bf16.mxu0 %vm3918_vm1, %v3917_v3  ;;  %v3880_v29 = vld [vmem:[%s4670_s22 + $0x18] sm:$0xff]  }
 0xcb2   :  { %3629 = vmatprep.subr.bf16.mxu0 %v3917_v3 }
 0xcb5   :  { %3630 = vmatpush3.bf16.msra.mxu0 %v3870_v30  ;;  %v3881_v30 = vld [vmem:[%s4670_s22 + $0x20] sm:$0xff]  }
 0xcb6   :  { %3631 = vmatprep.subr.bf16.mxu0 %v3917_v3 }
 0xcb9   :  { %3632 = vmatpush3.bf16.msra.mxu0 %v3871_v31  ;;  %v3882_v31 = vld [vmem:[%s4670_s22 + $0x28] sm:$0xff]  }
 0xcba   :  { %3633 = vmatprep.subr.bf16.mxu0 %v3917_v3 }
 0xcbd   :  { %3634 = vmatpush3.bf16.msra.mxu0 %v3872_v32  ;;  %v3883_v32 = vld [vmem:[%s4670_s22 + $0x30] sm:$0xff]  }
 0xcc0   :  { %3636 = vmatmul.mubr.msk.bf16.vlgmr.msra.gmra.mrb[44].mxu0 %vm589_vm4, %v2197_v21 }
 0xd93   :  { %v2267_v33 = vpop.f32.mrb[44].mxu0 }
 0xd94   :  { %v2276_v34 = vmul.f32 %v2267_v33, %v2267_v33  ;;  %v3637_v35 = vpop.f32.mrb[45].mxu0  ;;  %3647 = vmatprep.mubr.msk.f32.mxu1 %vm589_vm4, %v2267_v33 }
 0xd95   :  { %v2270_v36 = vpop.f32.mrb[46].mxu0  ;;  %v3888_v35 = vld [vmem:[%s4671_s23 + $0x38] sm:$0xff]  }
 0xd96   :  { %v3638_v37 = vpop.f32.mrb[47].mxu0  ;;  %3648 = vmatmul.mubr.msk.f32.vlgmr.msra.gmra.mrb[24].mxu1 %vm589_vm4, %v2270_v36  ;;  %v2277_v38 = vmul.f32 %v2270_v36, %v2270_v36 }
 0xd97   :  { %3650 = vmatprep.mubr.msk.f32.mxu1 %vm589_vm4, %v2276_v34  ;;  %3654 = vmatpush3.bf16.msra.mxu1 %v2412_v40  ;;  %v3887_v34 = vld [vmem:[%s4671_s23 + $0x30] sm:$0xff]  }
 0xd9a   :  { %3651 = vmatmul.mubr.msk.f32.gmra.mrb[26].mxu1 %vm589_vm4, %v2277_v38 }
 0xd9b   :  { %3655 = vmatprep.mubr.msk.f32.mxu1 %vm3918_vm1, %v3917_v3 }
 0xe69   :  { %v3649_v41 = vpop.f32.mrb[24].mxu1 }
 0xe6a   :  { %v2376_v42 = vsel %vm1028_vm7, %v3649_v41, 0.0  ;;  %v2356_v43 = vpop.f32.mrb[25].mxu1 }
 0xe6b   :  { %v2375_v44 = vsel %vm1028_vm7, %v2356_v43, 0.0 }
 0xe6c   :  { %v2377_v45 = vadd.f32 %v2376_v42, %v2375_v44 }
 0xe6d   :  { %v3652_v46 = vpop.f32.mrb[26].mxu1 }
 0xe6e   :  { %v2378_v47 = vrot.slane %v2377_v45, 4  ;;  %v2385_v48 = vsel %vm1028_vm7, %v3652_v46, 0.0  ;;  %v2366_v49 = vpop.f32.mrb[27].mxu1 }
 0xe6f   :  { %v2384_v3 = vsel %vm1028_vm7, %v2366_v49, 0.0  ;;  %v3890_v49 = vld [vmem:[%s4671_s23 + $0x8] sm:$0xff]  }
 0xe70   :  { %v2379_v50 = vadd.f32 %v2378_v47, %v2377_v45  ;;  %v2386_v51 = vadd.f32 %v2385_v48, %v2384_v3 }
 0xe72   :  { %v2380_v52 = vrot.slane %v2379_v50, 2  ;;  %v2387_v53 = vrot.slane %v2386_v51, 4 }
 0xe74   :  { %v2381_v54 = vadd.f32 %v2380_v52, %v2379_v50  ;;  %v2388_v55 = vadd.f32 %v2387_v53, %v2386_v51  ;;  %v3891_v50 = vld [vmem:[%s4671_s23 + $0x10] sm:$0xff]  }
 0xe76   :  { %v2382_v58 = vrot.slane %v2381_v54, 1  ;;  %v2389_v59 = vrot.slane %v2388_v55, 2 }
 0xe78   :  { %v2383_v60 = vadd.f32 %v2382_v58, %v2381_v54  ;;  %v2390_v61 = vadd.f32 %v2389_v59, %v2388_v55  ;;  %v3892_v58 = vld [vmem:[%s4671_s23 + $0x18] sm:$0xff]  }
 0xe7a   :  { %v2391_v62 = vrot.slane %v2390_v61, 1  ;;  %v2393_v63 = vmul.f32 %v2383_v60, %v2383_v60 }
 0xe7c   :  { %v2392_v0 = vadd.f32 %v2391_v62, %v2390_v61 }
 0xe7e   :  { %v2394_v1 = vsub.f32 %v2392_v0, %v2393_v63 }
 0xe80   :  { %v2395_v2 = vmax.f32 %v2394_v1, 0.0 }
 0xe82   :  { %v2396_v4 = vadd.f32 1e-05, %v2395_v2  ;;  %v3894_v2 = vld [vmem:[%s4671_s23 + $0x48] sm:$0xff]  }
 0xe84   :  { %3907 = vrsqrt.f32 %v2396_v4  ;;  %v3895_v4 = vld [vmem:[%s4671_s23 + $0x50] sm:$0xff]  }
 0xe8e   :  { %v3908_v6 = vpop.eup %3907 }
 0xe8f   :  { %v2399_v7 = vmul.f32 %v3908_v6, %v2398_v5  ;;  %v3896_v5 = vld [vmem:[%s4671_s23 + $0x58] sm:$0xff]   ;;  %v3897_v6 = vld [vmem:[%s4671_s23 + $0x60] sm:$0xff]  }
 0xe91   :  { %v2401_v9 = vmul.f32 %v2399_v7, %v2383_v60  ;;  %v3893_v60 = vld [vmem:[%s4671_s23 + $0x40] sm:$0xff]  }
 0xe93   :  { %v2402_v10 = vsub.f32 %v2400_v8, %v2401_v9  ;;  %v3899_v8 = vld [vmem:[%s4671_s23 + $0x70] sm:$0xff]   ;;  %v3900_v9 = vld [vmem:[%s4671_s23 + $0x78] sm:$0xff]  }
 0xe95   :  { %v2404_v11 = vrot.slane %v2402_v10, 7 }
 0xe97   :  { %v2406_v12 = vsel %vm963_vm5, %v2399_v7, %v2404_v11  ;;  %v3898_v7 = vld [vmem:[%s4671_s23 + $0x68] sm:$0xff]  }
 0xe98   :  { %3656 = vmatmul.mubr.msk.f32.vlgmr.msra.gmra.mrb[28].mxu1 %vm1028_vm7, %v2406_v12 }
 0xe99   :  { %3660 = vmatprep.mubr.msk.bf16.mxu1 %vm491_vm3, %v3877_v13 }
 0xf6b   :  { %v2448_v14 = vpop.f32.mrb[28].mxu1 }
 0xf6c   :  { %v2455_v15 = vrot.slane %v2448_v14, %v4265_v56  ;;  %v3657_v16 = vpop.f32.mrb[29].mxu1  ;;  %v2461_v19 = vrot.slane %v2448_v14, %v4267_v57  ;;  %v3878_v56 = vld [vmem:[%s4670_s22 + $0x8] sm:$0xff]   ;;  %v3879_v57 = vld [vmem:[%s4670_s22 + $0x10] sm:$0xff]  }
 0xf6e   :  { %v2456_v17 = vmul.f32 %v2455_v15, %v2267_v33  ;;  %v2457_v18 = vmul.f32 %v2455_v15, %v2270_v36  ;;  %v3884_v33 = vld [vmem:[%s4670_s22 + $0x38] sm:$0xff]   ;;  %v3889_v36 = vld [vmem:[%s4671_s23] sm:$0xff]  }
 0xf70   :  { %v2462_v20 = vadd.f32 %v2461_v19, %v2456_v17  ;;  %v2463_v21 = vadd.f32 %v2461_v19, %v2457_v18 }
 0xf72   :  { %v2464_v22 = vmul.f32 0.2, %v2462_v20  ;;  %v2465_v23 = vmul.f32 0.2, %v2463_v21 }
 0xf74   :  { %v2466_v24 = vmax.f32 %v2462_v20, %v2464_v22  ;;  %v2467_v25 = vmax.f32 %v2463_v21, %v2465_v23 }
 0xf76   :  { %v2484_v26 = vpack.c.bf16 %v2467_v25, %v2466_v24 }
 0xf78   :  { %3658 = vmatprep.subr.bf16.mxu1 %v2484_v26 }
 0xf79   :  { %3659 = vmatpush3.bf16.msra.mxu1 %v2484_v26 }
 0xf7a   :  { %3676 = vmatprep.subr.bf16.mxu1 %v3885_v27 }
 0xf7c   :  { %3661 = vmatmul.mubr.msk.bf16.vlgmr.msra.gmra.mrb[32].mxu1 %vm491_vm3, %v3878_v56 }
 0xf7d   :  { %3664 = vmatprep.mubr.msk.bf16.mxu1 %vm491_vm3, %v3879_v57  ;;  %3677 = vmatpush3.bf16.msra.mxu1 %v3885_v27 }
 0xf7e   :  { %3678 = vmatprep.subr.bf16.mxu1 %v3886_v28 }
 0xf81   :  { %3679 = vmatpush3.bf16.msra.mxu1 %v3886_v28 }
 0xf82   :  { %3680 = vmatprep.subr.bf16.mxu1 %v3887_v34 }
 0xf84   :  { %3665 = vmatmul.mubr.msk.bf16.gmra.mrb[36].mxu1 %vm491_vm3, %v3880_v29 }
 0xf85   :  { %3668 = vmatprep.mubr.msk.bf16.mxu1 %vm491_vm3, %v3881_v30  ;;  %3681 = vmatpush3.bf16.msra.mxu1 %v3887_v34 }
 0xf86   :  { %3682 = vmatprep.subr.bf16.mxu1 %v3888_v35 }
 0xf89   :  { %3683 = vmatpush3.bf16.msra.mxu1 %v3888_v35 }
 0xf8a   :  { %3688 = vmatprep.subr.bf16.mxu1 %v3889_v36 }
 0xf8c   :  { %3669 = vmatmul.mubr.msk.bf16.gmra.mrb[40].mxu1 %vm491_vm3, %v3882_v31 }
 0xf8d   :  { %3672 = vmatprep.mubr.msk.bf16.mxu1 %vm491_vm3, %v3883_v32 }
 0xf94   :  { %3673 = vmatmul.mubr.msk.bf16.gmra.mrb[44].mxu1 %vm491_vm3, %v3884_v33 }
0x104f   :  { %v3662_v37 = vpop.f32.mrb[32].mxu1 }
0x1050   :  { %v2583_v38 = vpop.f32.mrb[33].mxu1 }
0x1051   :  { %v3663_v39 = vpop.f32.mrb[34].mxu1 }
0x1052   :  { %v2647_v40 = vpack.c.bf16 %v3663_v39, %v3662_v37  ;;  %v2586_v41 = vpop.f32.mrb[35].mxu1 }
0x1053   :  { %v2646_v42 = vpack.c.bf16 %v2586_v41, %v2583_v38 }
0x1057   :  { %v3666_v43 = vpop.f32.mrb[36].mxu1 }
0x1058   :  { %v2599_v44 = vpop.f32.mrb[37].mxu1 }
0x1059   :  { %v3667_v45 = vpop.f32.mrb[38].mxu1 }
0x105a   :  { %v2657_v46 = vpack.c.bf16 %v3667_v45, %v3666_v43  ;;  %v2602_v47 = vpop.f32.mrb[39].mxu1 }
0x105b   :  { %v2656_v48 = vpack.c.bf16 %v2602_v47, %v2599_v44 }
0x105d   :  { %3684 = vmatprep.mubr.msk.bf16.mxu1 %vm589_vm4, %v2656_v48 }
0x105e   :  { %3685 = vmatmul.mubr.msk.bf16.vlgmr.msra.gmra.mrb[48].mxu1 %vm589_vm4, %v2657_v46 }
0x105f   :  { %3689 = vmatpush3.bf16.msra.mxu1 %v3889_v36  ;;  %3696 = vmatprep.mubr.msk.bf16.mxu1 %vm589_vm4, %v2646_v42  ;;  %v3670_v3 = vpop.f32.mrb[40].mxu1 }
0x1060   :  { %3690 = vmatprep.subr.bf16.mxu1 %v3890_v49  ;;  %v2615_v51 = vpop.f32.mrb[41].mxu1 }
0x1061   :  { %v3671_v52 = vpop.f32.mrb[42].mxu1 }
0x1062   :  { %v2825_v53 = vpack.c.bf16 %v3671_v52, %v3670_v3  ;;  %v2618_v54 = vpop.f32.mrb[43].mxu1 }
0x1063   :  { %3691 = vmatpush3.bf16.msra.mxu1 %v3890_v49  ;;  %v2824_v55 = vpack.c.bf16 %v2618_v54, %v2615_v51 }
0x1064   :  { %3692 = vmatprep.subr.bf16.mxu1 %v3891_v50 }
0x1067   :  { %3693 = vmatpush3.bf16.msra.mxu1 %v3891_v50  ;;  %v3674_v59 = vpop.f32.mrb[44].mxu1 }
0x1068   :  { %3694 = vmatprep.subr.bf16.mxu1 %v3892_v58  ;;  %v2631_v61 = vpop.f32.mrb[45].mxu1 }
0x1069   :  { %v3675_v62 = vpop.f32.mrb[46].mxu1 }
0x106a   :  { %v2918_v63 = vpack.c.bf16 %v3675_v62, %v3674_v59  ;;  %v2634_v0 = vpop.f32.mrb[47].mxu1 }
0x106b   :  { %3695 = vmatpush3.bf16.msra.mxu1 %v3892_v58  ;;  %v2917_v1 = vpack.c.bf16 %v2634_v0, %v2631_v61 }
0x106c   :  { %3700 = vmatprep.subr.bf16.mxu1 %v3893_v60 }
0x106e   :  { %3697 = vmatmul.mubr.msk.bf16.vlgmr.msra.gmra.mrb[48].mxu1 %vm589_vm4, %v2647_v40 }
0x106f   :  { %3701 = vmatpush3.bf16.msra.mxu1 %v3893_v60  ;;  %3708 = vmatprep.mubr.msk.bf16.mxu1 %vm589_vm4, %v2824_v55 }
0x1070   :  { %3702 = vmatprep.subr.bf16.mxu1 %v3894_v2 }
0x1073   :  { %3703 = vmatpush3.bf16.msra.mxu1 %v3894_v2 }
0x1074   :  { %3704 = vmatprep.subr.bf16.mxu1 %v3895_v4 }
0x1077   :  { %3705 = vmatpush3.bf16.msra.mxu1 %v3895_v4 }
0x1078   :  { %3706 = vmatprep.subr.bf16.mxu1 %v3896_v5 }
0x107b   :  { %3707 = vmatpush3.bf16.msra.mxu1 %v3896_v5 }
0x107c   :  { %3712 = vmatprep.subr.bf16.mxu1 %v3897_v6 }
0x107e   :  { %3709 = vmatmul.mubr.msk.bf16.vlgmr.msra.gmra.mrb[48].mxu1 %vm589_vm4, %v2825_v53 }
0x107f   :  { %3713 = vmatpush3.bf16.msra.mxu1 %v3897_v6  ;;  %3720 = vmatprep.mubr.msk.bf16.mxu1 %vm589_vm4, %v2917_v1 }
0x1080   :  { %3714 = vmatprep.subr.bf16.mxu1 %v3898_v7 }
0x1083   :  { %3715 = vmatpush3.bf16.msra.mxu1 %v3898_v7 }
0x1084   :  { %3716 = vmatprep.subr.bf16.mxu1 %v3899_v8 }
0x1087   :  { %3717 = vmatpush3.bf16.msra.mxu1 %v3899_v8 }
0x1088   :  { %3718 = vmatprep.subr.bf16.mxu1 %v3900_v9 }
0x108b   :  { %3719 = vmatpush3.bf16.msra.mxu1 %v3900_v9 }
0x108e   :  { %3721 = vmatmul.mubr.msk.bf16.vlgmr.msra.gmra.mrb[48].mxu1 %vm589_vm4, %v2918_v63 }
0x1161   :  { %v3722_v10 = vpop.f32.mrb[48].mxu1 }
0x1162   :  { %3909 = vtanh.f32 %v3722_v10  ;;  %v2991_v11 = vpop.f32.mrb[49].mxu1 }
0x1163   :  { %3911 = vtanh.f32 %v2991_v11  ;;  %v3723_v12 = vpop.f32.mrb[50].mxu1 }
0x1164   :  { %3913 = vtanh.f32 %v3723_v12  ;;  %v2994_v13 = vpop.f32.mrb[51].mxu1 }
0x1165   :  { %3915 = vtanh.f32 %v2994_v13 }
0x116c   :  { %v3910_v14 = vpop.eup %3909 }
0x116d   :  { %v3912_v15 = vpop.eup %3911  ;;  %3016 = vst.msk [vmem:[%s4672_s24 + $0x10] sm:$0xff] %vm223_vm2, %v3910_v14 }
0x116e   :  { %v3914_v16 = vpop.eup %3913  ;;  %3014 = vst.msk [vmem:[%s4672_s24] sm:$0xff] %vm223_vm2, %v3912_v15 }
0x116f   :  { %v3916_v17 = vpop.eup %3915  ;;  %3017 = vst.msk [vmem:[%s4672_s24 + $0x18] sm:$0xff] %vm223_vm2, %v3914_v16 }
0x1170   :  { %3015 = vst.msk [vmem:[%s4672_s24 + $0x8] sm:$0xff] %vm223_vm2, %v3916_v17 }

</bundles_post_ra>
